<compile_context>
chip_gen: v5e
topology: v5e:2x2
jax: 0.10.0
libtpu: 0.0.40
codegen_flags: <defaults>
</compile_context>

<pallas_src>
import functools

import jax
import jax.numpy as jnp
from jax.experimental import pallas as pl
from jax.experimental.pallas import tpu as pltpu

BN_EPS = 1e-5
LANE = 128


def _round_up(x, m):
    return ((x + m - 1) // m) * m


def _pick_batch_tile(n, target=8):
    """Largest divisor of n <= target; avoid a degenerate single-step grid."""
    tb = 1
    for t in range(min(n, target), 0, -1):
        if n % t == 0:
            tb = t
            break
    if n > 1 and n // tb == 1:
        for t in range(max(1, n // 2), 0, -1):
            if n % t == 0:
                return t
    return tb


# ----------------------------- Pallas kernels ------------------------------


def _make_block_kernel(stride, downsample, tb, ho, wo, cpin, cpout):
    """Fused BasicBlock kernel (conv-BN-ReLU, conv-BN, residual, ReLU)."""
    nx = 1 if stride == 1 else 4
    m = tb * ho * wo

    def kernel(*refs):
        xrefs = refs[:nx]
        idx = nx
        w1_ref, b1_ref, w2_ref, b2_ref = refs[idx:idx + 4]
        idx += 4
        if downsample:
            wd_ref, bd_ref = refs[idx:idx + 2]
            idx += 2
        o_ref = refs[idx]
        pad_ref = refs[idx + 1]            # VMEM scratch: spatially padded h1

        # ---- conv1: 3x3 (stride folded into the phase views) + BN + ReLU ----
        taps = []
        for kh in range(3):
            for kw in range(3):
                if stride == 1:
                    taps.append(xrefs[0][:, kh:kh + ho, kw:kw + wo, :])
                else:
                    ph = xrefs[(kh % 2) * 2 + (kw % 2)]
                    taps.append(ph[:, kh // 2:kh // 2 + ho,
                                   kw // 2:kw // 2 + wo, :])
        p1 = jnp.concatenate(taps, axis=-1).reshape(m, 9 * cpin)        # bf16
        a1 = jnp.dot(p1, w1_ref[...], preferred_element_type=jnp.float32)
        h1 = jnp.maximum(a1 + b1_ref[...], 0.0)

        # ---- stage conv1 output (zero spatial border) in VMEM scratch ----
        pad_ref[...] = jnp.zeros(pad_ref.shape, pad_ref.dtype)
        pad_ref[:, 1:1 + ho, 1:1 + wo, :] = (
            h1.reshape(tb, ho, wo, cpout).astype(pad_ref.dtype))

        # ---- conv2: 3x3 stride 1 + BN (scale folded into w2) ----
        taps2 = [pad_ref[:, kh:kh + ho, kw:kw + wo, :]
                 for kh in range(3) for kw in range(3)]
        p2 = jnp.concatenate(taps2, axis=-1).reshape(m, 9 * cpout)
        a2 = jnp.dot(p2, w2_ref[...], preferred_element_type=jnp.float32)
        a2 = a2 + b2_ref[...]

        # ---- residual path ----
        if downsample:
            if stride == 1:
                xs = xrefs[0][:, 1:1 + ho, 1:1 + wo, :]
            else:
                xs = xrefs[3][:, 0:ho, 0:wo, :]   # odd/odd phase == x[:, ::2, ::2]
            res = jnp.dot(xs.reshape(m, cpin), wd_ref[...],
                          preferred_element_type=jnp.float32) + bd_ref[...]
        else:
            xs = xrefs[0][:, 1:1 + ho, 1:1 + wo, :]
            res = xs.reshape(m, cpout).astype(jnp.float32)

        out = jnp.maximum(a2 + res, 0.0)
        o_ref[...] = out.reshape(tb, ho, wo, cpout).astype(o_ref.dtype)

    return kernel, nx


def basic_block_pallas(x, blk):
    """x: (N, H, W, Cp_in) bf16, channel-padded (pad channels are zero)."""
    n, h, w, cpin = x.shape
    stride = blk["stride"]
    downsample = blk["downsample"]
    cpout = blk["w1p"].shape[1]

    if stride == 1:
        ho, wo = h, w
    else:
        assert h % 2 == 0 and w % 2 == 0, "stride-2 block expects even spatial"
        ho, wo = h // 2, w // 2

    xp = jnp.pad(x, ((0, 0), (1, 1), (1, 1), (0, 0)))
    if stride == 1:
        x_inputs = [xp]
    else:
        # Parity phases of the padded input: every in-kernel slice becomes
        # contiguous (no strided VMEM access); phase (1,1) is x[:, ::2, ::2].
        x_inputs = [xp[:, ph::2, pw::2, :] for ph in (0, 1) for pw in (0, 1)]

    tb = _pick_batch_tile(n)
    nb = n // tb

    kernel, _ = _make_block_kernel(stride, downsample, tb, ho, wo, cpin, cpout)

    w_args = [blk["w1p"], blk["b1p"], blk["w2p"], blk["b2p"]]
    if downsample:
        w_args += [blk["wdp"], blk["bdp"]]

    in_specs = [pl.BlockSpec((tb,) + xin.shape[1:], lambda b: (b, 0, 0, 0))
                for xin in x_inputs]
    in_specs += [pl.BlockSpec(wa.shape, lambda b: (0, 0)) for wa in w_args]
    out_spec = pl.BlockSpec((tb, ho, wo, cpout), lambda b: (b, 0, 0, 0))

    flops = 2 * n * ho * wo * (9 * cpin) * cpout
    flops += 2 * n * ho * wo * (9 * cpout) * cpout
    if downsample:
        flops += 2 * n * ho * wo * cpin * cpout
    bytes_accessed = int(sum(int(a.size) * a.dtype.itemsize
                             for a in x_inputs + w_args)
                         + n * ho * wo * cpout * 2)

    return pl.pallas_call(
        kernel,
        out_shape=jax.ShapeDtypeStruct((n, ho, wo, cpout), jnp.bfloat16),
        grid=(nb,),
        in_specs=in_specs,
        out_specs=out_spec,
        scratch_shapes=[pltpu.VMEM((tb, ho + 2, wo + 2, cpout), jnp.bfloat16)],
        compiler_params=pltpu.CompilerParams(
            dimension_semantics=("parallel",),
            vmem_limit_bytes=32 * 1024 * 1024),
        cost_estimate=pl.CostEstimate(flops=int(flops), transcendentals=0,
                                      bytes_accessed=bytes_accessed),
    )(*(x_inputs + w_args))


def _head_kernel(x_ref, w_ref, b_ref, mask_ref, oh_ref, logits_ref, nll_ref,
                 *, inv_hw):
    x = x_ref[...].astype(jnp.float32)                      # (tb, ho, wo, cp)
    tb, ho, wo, cp = x.shape
    pooled = jnp.sum(x.reshape(tb, ho * wo, cp), axis=1) * inv_hw
    logits = jnp.dot(pooled, w_ref[...],
                     preferred_element_type=jnp.float32) + b_ref[...]
    logits = logits + mask_ref[...]          # -1e30 on padded class columns
    logits_ref[...] = logits                 # lane-dense (tb, 128) store
    mx = jnp.max(logits, axis=-1, keepdims=True)
    lse = mx + jnp.log(jnp.sum(jnp.exp(logits - mx), axis=-1, keepdims=True))
    logp = logits - lse
    nll = -jnp.sum(oh_ref[...] * logp, axis=-1, keepdims=True)
    nll_ref[...] = jnp.broadcast_to(nll, nll_ref.shape)     # lane-dense store


def head_pallas(x, w_head_p, b_head_p, mask_p, onehot_p):
    n, ho, wo, cp = x.shape
    ncls_p = w_head_p.shape[1]
    tb = n if (n < 8 or n % 8 != 0) else 8
    nb = n // tb
    kernel = functools.partial(_head_kernel, inv_hw=1.0 / float(ho * wo))
    logits_p, nll_p = pl.pallas_call(
        kernel,
        out_shape=(jax.ShapeDtypeStruct((n, ncls_p), jnp.float32),
                   jax.ShapeDtypeStruct((n, ncls_p), jnp.float32)),
        grid=(nb,),
        in_specs=[
            pl.BlockSpec((tb, ho, wo, cp), lambda b: (b, 0, 0, 0)),
            pl.BlockSpec(w_head_p.shape, lambda b: (0, 0)),
            pl.BlockSpec(b_head_p.shape, lambda b: (0, 0)),
            pl.BlockSpec(mask_p.shape, lambda b: (0, 0)),
            pl.BlockSpec((tb, ncls_p), lambda b: (b, 0)),
        ],
        out_specs=(pl.BlockSpec((tb, ncls_p), lambda b: (b, 0)),
                   pl.BlockSpec((tb, ncls_p), lambda b: (b, 0))),
        compiler_params=pltpu.CompilerParams(
            dimension_semantics=("parallel",)),
    )(x, w_head_p, b_head_p, mask_p, onehot_p)
    return logits_p, nll_p


# ------------------------------- JAX glue ----------------------------------


def infopro_resnet_back_forward(params, x_nchw, target, class_num):
    """Eval-mode forward: Encoder_Net (= layer3 blocks) -> avgpool -> head -> CE."""
    x = jnp.transpose(x_nchw, (0, 2, 3, 1)).astype(jnp.float32)   # NCHW -> NHWC
    cin = x.shape[-1]
    cpin = params["blocks"][0]["w1p"].shape[0] // 9
    x = jnp.pad(x, ((0, 0), (0, 0), (0, 0), (0, cpin - cin))).astype(jnp.bfloat16)

    for blk in params["blocks"]:
        x = basic_block_pallas(x, blk)

    ncls_p = params["head_wp"].shape[1]
    onehot = jax.nn.one_hot(target, ncls_p, dtype=jnp.float32)
    logits_p, nll_p = head_pallas(x, params["head_wp"], params["head_bp"],
                                  params["head_mask"], onehot)
    logits = logits_p[:, :class_num]
    loss = jnp.mean(nll_p[:, 0])            # CrossEntropyLoss(reduction='mean')
    return logits, loss


# --------------------------- deterministic init -----------------------------


def init_params(key, inplanes, planes, num_blocks, class_num):
    """PyTorch-equivalent init (conv ~ N(0, sqrt(2/n)), BN gamma=1 / beta=0,
    fresh running stats), then BN-fold + lane-pad for the Pallas kernels."""
    cpin0 = _round_up(inplanes, LANE)
    cp = _round_up(planes, LANE)
    ncls_p = _round_up(class_num, LANE)

    def conv_w(k, kh, kw, cin, cout):
        nfan = kh * kw * cout
        return (jax.random.normal(k, (kh, kw, cin, cout), jnp.float32)
                * jnp.sqrt(2.0 / nfan))

    def fold_pad(w, cin_p, cout_p):
        kh, kw, cin, cout = w.shape
        gamma = jnp.ones((cout,), jnp.float32)
        beta = jnp.zeros((cout,), jnp.float32)
        mean = jnp.zeros((cout,), jnp.float32)      # fresh running stats (eval)
        var = jnp.ones((cout,), jnp.float32)
        scale = gamma / jnp.sqrt(var + BN_EPS)
        shift = beta - mean * scale
        wf = w * scale[None, None, None, :]          # fold BN scale into conv
        wp = jnp.zeros((kh, kw, cin_p, cout_p), jnp.float32)
        wp = wp.at[:, :, :cin, :cout].set(wf)
        wp = wp.reshape(kh * kw * cin_p, cout_p).astype(jnp.bfloat16)
        sp = jnp.zeros((1, cout_p), jnp.float32).at[0, :cout].set(shift)
        return wp, sp

    params = {"blocks": []}
    keys = jax.random.split(key, num_blocks * 3 + 1)
    ki = 0
    cin, cin_p = inplanes, cpin0
    for b in range(num_blocks):
        stride = 2 if b == 0 else 1
        ds = (stride != 1) or (cin != planes)
        blk = {"stride": stride, "downsample": ds}
        blk["w1p"], blk["b1p"] = fold_pad(conv_w(keys[ki], 3, 3, cin, planes),
                                          cin_p, cp)
        ki += 1
        blk["w2p"], blk["b2p"] = fold_pad(conv_w(keys[ki], 3, 3, planes, planes),
                                          cp, cp)
        ki += 1
        if ds:
            blk["wdp"], blk["bdp"] = fold_pad(conv_w(keys[ki], 1, 1, cin, planes),
                                              cin_p, cp)
        ki += 1
        params["blocks"].append(blk)
        cin, cin_p = planes, cp

    w_head = jax.random.normal(keys[ki], (planes, class_num), jnp.float32) * 0.05
    params["head_wp"] = (jnp.zeros((cp, ncls_p), jnp.float32)
                         .at[:planes, :class_num].set(w_head))
    params["head_bp"] = jnp.zeros((1, ncls_p), jnp.float32)
    params["head_mask"] = (jnp.full((1, ncls_p), -1e30, jnp.float32)
                           .at[0, :class_num].set(0.0))
    return params


# --------------------------------- main -------------------------------------

if __name__ == "__main__":
    key = jax.random.PRNGKey(0)
    k_x, k_p, k_t = jax.random.split(key, 3)

    # small shapes consistent with the module: NCHW input to layer3 of a
    # CIFAR resnet, downsampled by the stride-2 first block.
    batch, inplanes, planes = 2, 8, 16
    spatial, class_num, num_blocks = 8, 10, 2     # layers = [2]

    x = jax.random.normal(k_x, (batch, inplanes, spatial, spatial), jnp.float32)
    target = jax.random.randint(k_t, (batch,), 0, class_num)
    params = init_params(k_p, inplanes, planes, num_blocks, class_num)

    logits, loss = infopro_resnet_back_forward(params, x, target, class_num)
    jax.block_until_ready((logits, loss))

    assert logits.shape == (batch, class_num)
    assert loss.shape == ()
    assert bool(jnp.isfinite(loss))
    print("KERNEL_OK")
</pallas_src>

<mosaic_0001>
module attributes {stable_mosaic.version = 11 : i64} {
  func.func @kernel(%arg0: i32, %arg1: memref<1x5x5x128xbf16, #tpu.memory_space<vmem>>, %arg2: memref<1x5x5x128xbf16, #tpu.memory_space<vmem>>, %arg3: memref<1x5x5x128xbf16, #tpu.memory_space<vmem>>, %arg4: memref<1x5x5x128xbf16, #tpu.memory_space<vmem>>, %arg5: memref<1152x128xbf16, #tpu.memory_space<vmem>>, %arg6: memref<1x128xf32, #tpu.memory_space<vmem>>, %arg7: memref<1152x128xbf16, #tpu.memory_space<vmem>>, %arg8: memref<1x128xf32, #tpu.memory_space<vmem>>, %arg9: memref<128x128xbf16, #tpu.memory_space<vmem>>, %arg10: memref<1x128xf32, #tpu.memory_space<vmem>>, %arg11: memref<1x4x4x128xbf16, #tpu.memory_space<vmem>>, %arg12: memref<1x6x6x128xbf16, #tpu.memory_space<vmem>>) attributes {dimension_semantics = [#tpu.dimension_semantics<parallel>], iteration_bounds = array<i64: 2>, scalar_prefetch = 0 : i64, scratch_operands = 1 : i64, tpu.core_type = #tpu.core_type<tc>, window_params = [{transform_indices = @transform_0, window_bounds = array<i64: 1, 5, 5, 128>}, {transform_indices = @transform_1, window_bounds = array<i64: 1, 5, 5, 128>}, {transform_indices = @transform_2, window_bounds = array<i64: 1, 5, 5, 128>}, {transform_indices = @transform_3, window_bounds = array<i64: 1, 5, 5, 128>}, {pipeline_mode = #tpu.pipeline_mode<synchronous>, transform_indices = @transform_4, window_bounds = array<i64: 1152, 128>}, {pipeline_mode = #tpu.pipeline_mode<synchronous>, transform_indices = @transform_5, window_bounds = array<i64: 1, 128>}, {pipeline_mode = #tpu.pipeline_mode<synchronous>, transform_indices = @transform_6, window_bounds = array<i64: 1152, 128>}, {pipeline_mode = #tpu.pipeline_mode<synchronous>, transform_indices = @transform_7, window_bounds = array<i64: 1, 128>}, {pipeline_mode = #tpu.pipeline_mode<synchronous>, transform_indices = @transform_8, window_bounds = array<i64: 128, 128>}, {pipeline_mode = #tpu.pipeline_mode<synchronous>, transform_indices = @transform_9, window_bounds = array<i64: 1, 128>}, {transform_indices = @transform_10, window_bounds = array<i64: 1, 4, 4, 128>}]} {
    %c0 = arith.constant 0 : index
    %c0_0 = arith.constant 0 : index
    %c0_1 = arith.constant 0 : index
    %c0_2 = arith.constant 0 : index
    %0 = vector.load %arg1[%c0, %c0_0, %c0_1, %c0_2] : memref<1x5x5x128xbf16, #tpu.memory_space<vmem>>, vector<1x4x4x128xbf16>
    %c0_3 = arith.constant 0 : index
    %c0_4 = arith.constant 0 : index
    %c0_5 = arith.constant 0 : index
    %c0_6 = arith.constant 0 : index
    %1 = vector.load %arg2[%c0_3, %c0_4, %c0_5, %c0_6] : memref<1x5x5x128xbf16, #tpu.memory_space<vmem>>, vector<1x4x4x128xbf16>
    %c0_7 = arith.constant 0 : index
    %c0_8 = arith.constant 0 : index
    %c1 = arith.constant 1 : index
    %c0_9 = arith.constant 0 : index
    %2 = vector.load %arg1[%c0_7, %c0_8, %c1, %c0_9] : memref<1x5x5x128xbf16, #tpu.memory_space<vmem>>, vector<1x4x4x128xbf16>
    %c0_10 = arith.constant 0 : index
    %c0_11 = arith.constant 0 : index
    %c0_12 = arith.constant 0 : index
    %c0_13 = arith.constant 0 : index
    %3 = vector.load %arg3[%c0_10, %c0_11, %c0_12, %c0_13] : memref<1x5x5x128xbf16, #tpu.memory_space<vmem>>, vector<1x4x4x128xbf16>
    %c0_14 = arith.constant 0 : index
    %c0_15 = arith.constant 0 : index
    %c0_16 = arith.constant 0 : index
    %c0_17 = arith.constant 0 : index
    %4 = vector.load %arg4[%c0_14, %c0_15, %c0_16, %c0_17] : memref<1x5x5x128xbf16, #tpu.memory_space<vmem>>, vector<1x4x4x128xbf16>
    %c0_18 = arith.constant 0 : index
    %c0_19 = arith.constant 0 : index
    %c1_20 = arith.constant 1 : index
    %c0_21 = arith.constant 0 : index
    %5 = vector.load %arg3[%c0_18, %c0_19, %c1_20, %c0_21] : memref<1x5x5x128xbf16, #tpu.memory_space<vmem>>, vector<1x4x4x128xbf16>
    %c0_22 = arith.constant 0 : index
    %c1_23 = arith.constant 1 : index
    %c0_24 = arith.constant 0 : index
    %c0_25 = arith.constant 0 : index
    %6 = vector.load %arg1[%c0_22, %c1_23, %c0_24, %c0_25] : memref<1x5x5x128xbf16, #tpu.memory_space<vmem>>, vector<1x4x4x128xbf16>
    %c0_26 = arith.constant 0 : index
    %c1_27 = arith.constant 1 : index
    %c0_28 = arith.constant 0 : index
    %c0_29 = arith.constant 0 : index
    %7 = vector.load %arg2[%c0_26, %c1_27, %c0_28, %c0_29] : memref<1x5x5x128xbf16, #tpu.memory_space<vmem>>, vector<1x4x4x128xbf16>
    %c0_30 = arith.constant 0 : index
    %c1_31 = arith.constant 1 : index
    %c1_32 = arith.constant 1 : index
    %c0_33 = arith.constant 0 : index
    %8 = vector.load %arg1[%c0_30, %c1_31, %c1_32, %c0_33] : memref<1x5x5x128xbf16, #tpu.memory_space<vmem>>, vector<1x4x4x128xbf16>
    %9 = tpu.concatenate %0, %1, %2, %3, %4, %5, %6, %7, %8 in 3 : vector<1x4x4x128xbf16>, vector<1x4x4x128xbf16>, vector<1x4x4x128xbf16>, vector<1x4x4x128xbf16>, vector<1x4x4x128xbf16>, vector<1x4x4x128xbf16>, vector<1x4x4x128xbf16>, vector<1x4x4x128xbf16>, vector<1x4x4x128xbf16> -> vector<1x4x4x1152xbf16>
    %10 = vector.shape_cast %9 : vector<1x4x4x1152xbf16> to vector<16x1152xbf16>
    %c0_34 = arith.constant 0 : index
    %c0_35 = arith.constant 0 : index
    %11 = vector.load %arg5[%c0_34, %c0_35] : memref<1152x128xbf16, #tpu.memory_space<vmem>>, vector<1152x128xbf16>
    %cst = arith.constant dense<0.000000e+00> : vector<16x128xf32>
    %12 = tpu.matmul %10, %11, %cst {dimension_numbers = #tpu.dot_dimension_numbers<[1], [0], [0], [1], [0, 0, 1, 1], [], []>} : vector<16x1152xbf16>, vector<1152x128xbf16>, vector<16x128xf32> -> vector<16x128xf32>
    %c0_36 = arith.constant 0 : index
    %c0_37 = arith.constant 0 : index
    %13 = vector.load %arg6[%c0_36, %c0_37] : memref<1x128xf32, #tpu.memory_space<vmem>>, vector<1x128xf32>
    %14 = vector.broadcast %13 : vector<1x128xf32> to vector<16x128xf32>
    %15 = arith.addf %12, %14 : vector<16x128xf32>
    %cst_38 = arith.constant 0.000000e+00 : f32
    %16 = vector.broadcast %cst_38 : f32 to vector<16x128xf32>
    %17 = arith.maximumf %15, %16 : vector<16x128xf32>
    %cst_39 = arith.constant 0.000000e+00 : bf16
    %18 = vector.broadcast %cst_39 : bf16 to vector<1x6x6x128xbf16>
    %c0_40 = arith.constant 0 : index
    %c0_41 = arith.constant 0 : index
    %c0_42 = arith.constant 0 : index
    %c0_43 = arith.constant 0 : index
    %19 = vector.load %arg12[%c0_40, %c0_41, %c0_42, %c0_43] : memref<1x6x6x128xbf16, #tpu.memory_space<vmem>>, vector<1x6x6x128xbf16>
    tpu.vector_store %arg12[%c0_40, %c0_41, %c0_42, %c0_43], %18 {strides = array<i32>} : memref<1x6x6x128xbf16, #tpu.memory_space<vmem>>, vector<1x6x6x128xbf16>,
    %20 = vector.shape_cast %17 : vector<16x128xf32> to vector<1x4x4x128xf32>
    %21 = arith.truncf %20 : vector<1x4x4x128xf32> to vector<1x4x4x128xbf16>
    %c0_44 = arith.constant 0 : index
    %c1_45 = arith.constant 1 : index
    %c1_46 = arith.constant 1 : index
    %c0_47 = arith.constant 0 : index
    %22 = vector.load %arg12[%c0_44, %c1_45, %c1_46, %c0_47] : memref<1x6x6x128xbf16, #tpu.memory_space<vmem>>, vector<1x4x4x128xbf16>
    tpu.vector_store %arg12[%c0_44, %c1_45, %c1_46, %c0_47], %21 {strides = array<i32>} : memref<1x6x6x128xbf16, #tpu.memory_space<vmem>>, vector<1x4x4x128xbf16>,
    %c0_48 = arith.constant 0 : index
    %c0_49 = arith.constant 0 : index
    %c0_50 = arith.constant 0 : index
    %c0_51 = arith.constant 0 : index
    %23 = vector.load %arg12[%c0_48, %c0_49, %c0_50, %c0_51] : memref<1x6x6x128xbf16, #tpu.memory_space<vmem>>, vector<1x4x4x128xbf16>
    %c0_52 = arith.constant 0 : index
    %c0_53 = arith.constant 0 : index
    %c1_54 = arith.constant 1 : index
    %c0_55 = arith.constant 0 : index
    %24 = vector.load %arg12[%c0_52, %c0_53, %c1_54, %c0_55] : memref<1x6x6x128xbf16, #tpu.memory_space<vmem>>, vector<1x4x4x128xbf16>
    %c0_56 = arith.constant 0 : index
    %c0_57 = arith.constant 0 : index
    %c2 = arith.constant 2 : index
    %c0_58 = arith.constant 0 : index
    %25 = vector.load %arg12[%c0_56, %c0_57, %c2, %c0_58] : memref<1x6x6x128xbf16, #tpu.memory_space<vmem>>, vector<1x4x4x128xbf16>
    %c0_59 = arith.constant 0 : index
    %c1_60 = arith.constant 1 : index
    %c0_61 = arith.constant 0 : index
    %c0_62 = arith.constant 0 : index
    %26 = vector.load %arg12[%c0_59, %c1_60, %c0_61, %c0_62] : memref<1x6x6x128xbf16, #tpu.memory_space<vmem>>, vector<1x4x4x128xbf16>
    %c0_63 = arith.constant 0 : index
    %c1_64 = arith.constant 1 : index
    %c1_65 = arith.constant 1 : index
    %c0_66 = arith.constant 0 : index
    %27 = vector.load %arg12[%c0_63, %c1_64, %c1_65, %c0_66] : memref<1x6x6x128xbf16, #tpu.memory_space<vmem>>, vector<1x4x4x128xbf16>
    %c0_67 = arith.constant 0 : index
    %c1_68 = arith.constant 1 : index
    %c2_69 = arith.constant 2 : index
    %c0_70 = arith.constant 0 : index
    %28 = vector.load %arg12[%c0_67, %c1_68, %c2_69, %c0_70] : memref<1x6x6x128xbf16, #tpu.memory_space<vmem>>, vector<1x4x4x128xbf16>
    %c0_71 = arith.constant 0 : index
    %c2_72 = arith.constant 2 : index
    %c0_73 = arith.constant 0 : index
    %c0_74 = arith.constant 0 : index
    %29 = vector.load %arg12[%c0_71, %c2_72, %c0_73, %c0_74] : memref<1x6x6x128xbf16, #tpu.memory_space<vmem>>, vector<1x4x4x128xbf16>
    %c0_75 = arith.constant 0 : index
    %c2_76 = arith.constant 2 : index
    %c1_77 = arith.constant 1 : index
    %c0_78 = arith.constant 0 : index
    %30 = vector.load %arg12[%c0_75, %c2_76, %c1_77, %c0_78] : memref<1x6x6x128xbf16, #tpu.memory_space<vmem>>, vector<1x4x4x128xbf16>
    %c0_79 = arith.constant 0 : index
    %c2_80 = arith.constant 2 : index
    %c2_81 = arith.constant 2 : index
    %c0_82 = arith.constant 0 : index
    %31 = vector.load %arg12[%c0_79, %c2_80, %c2_81, %c0_82] : memref<1x6x6x128xbf16, #tpu.memory_space<vmem>>, vector<1x4x4x128xbf16>
    %32 = tpu.concatenate %23, %24, %25, %26, %27, %28, %29, %30, %31 in 3 : vector<1x4x4x128xbf16>, vector<1x4x4x128xbf16>, vector<1x4x4x128xbf16>, vector<1x4x4x128xbf16>, vector<1x4x4x128xbf16>, vector<1x4x4x128xbf16>, vector<1x4x4x128xbf16>, vector<1x4x4x128xbf16>, vector<1x4x4x128xbf16> -> vector<1x4x4x1152xbf16>
    %33 = vector.shape_cast %32 : vector<1x4x4x1152xbf16> to vector<16x1152xbf16>
    %c0_83 = arith.constant 0 : index
    %c0_84 = arith.constant 0 : index
    %34 = vector.load %arg7[%c0_83, %c0_84] : memref<1152x128xbf16, #tpu.memory_space<vmem>>, vector<1152x128xbf16>
    %cst_85 = arith.constant dense<0.000000e+00> : vector<16x128xf32>
    %35 = tpu.matmul %33, %34, %cst_85 {dimension_numbers = #tpu.dot_dimension_numbers<[1], [0], [0], [1], [0, 0, 1, 1], [], []>} : vector<16x1152xbf16>, vector<1152x128xbf16>, vector<16x128xf32> -> vector<16x128xf32>
    %c0_86 = arith.constant 0 : index
    %c0_87 = arith.constant 0 : index
    %36 = vector.load %arg8[%c0_86, %c0_87] : memref<1x128xf32, #tpu.memory_space<vmem>>, vector<1x128xf32>
    %37 = vector.broadcast %36 : vector<1x128xf32> to vector<16x128xf32>
    %38 = arith.addf %35, %37 : vector<16x128xf32>
    %c0_88 = arith.constant 0 : index
    %c0_89 = arith.constant 0 : index
    %c0_90 = arith.constant 0 : index
    %c0_91 = arith.constant 0 : index
    %39 = vector.load %arg4[%c0_88, %c0_89, %c0_90, %c0_91] : memref<1x5x5x128xbf16, #tpu.memory_space<vmem>>, vector<1x4x4x128xbf16>
    %40 = vector.shape_cast %39 : vector<1x4x4x128xbf16> to vector<16x128xbf16>
    %c0_92 = arith.constant 0 : index
    %c0_93 = arith.constant 0 : index
    %41 = vector.load %arg9[%c0_92, %c0_93] : memref<128x128xbf16, #tpu.memory_space<vmem>>, vector<128x128xbf16>
    %cst_94 = arith.constant dense<0.000000e+00> : vector<16x128xf32>
    %42 = tpu.matmul %40, %41, %cst_94 {dimension_numbers = #tpu.dot_dimension_numbers<[1], [0], [0], [1], [0, 0, 1, 1], [], []>} : vector<16x128xbf16>, vector<128x128xbf16>, vector<16x128xf32> -> vector<16x128xf32>
    %c0_95 = arith.constant 0 : index
    %c0_96 = arith.constant 0 : index
    %43 = vector.load %arg10[%c0_95, %c0_96] : memref<1x128xf32, #tpu.memory_space<vmem>>, vector<1x128xf32>
    %44 = vector.broadcast %43 : vector<1x128xf32> to vector<16x128xf32>
    %45 = arith.addf %42, %44 : vector<16x128xf32>
    %46 = arith.addf %38, %45 : vector<16x128xf32>
    %cst_97 = arith.constant 0.000000e+00 : f32
    %47 = vector.broadcast %cst_97 : f32 to vector<16x128xf32>
    %48 = arith.maximumf %46, %47 : vector<16x128xf32>
    %49 = vector.shape_cast %48 : vector<16x128xf32> to vector<1x4x4x128xf32>
    %50 = arith.truncf %49 : vector<1x4x4x128xf32> to vector<1x4x4x128xbf16>
    %c0_98 = arith.constant 0 : index
    %c0_99 = arith.constant 0 : index
    %c0_100 = arith.constant 0 : index
    %c0_101 = arith.constant 0 : index
    %51 = vector.load %arg11[%c0_98, %c0_99, %c0_100, %c0_101] : memref<1x4x4x128xbf16, #tpu.memory_space<vmem>>, vector<1x4x4x128xbf16>
    tpu.vector_store %arg11[%c0_98, %c0_99, %c0_100, %c0_101], %50 {strides = array<i32>} : memref<1x4x4x128xbf16, #tpu.memory_space<vmem>>, vector<1x4x4x128xbf16>,
    return
  }
  func.func @transform_0(%arg0: i32) -> (i32, i32, i32, i32) {
    %c0_i32 = arith.constant 0 : i32
    %c0_i32_0 = arith.constant 0 : i32
    %c0_i32_1 = arith.constant 0 : i32
    %c0_i32_2 = arith.constant 0 : i32
    return %arg0, %c0_i32, %c0_i32_0, %c0_i32_1 : i32, i32, i32, i32
  }
  func.func @transform_1(%arg0: i32) -> (i32, i32, i32, i32) {
    %c0_i32 = arith.constant 0 : i32
    %c0_i32_0 = arith.constant 0 : i32
    %c0_i32_1 = arith.constant 0 : i32
    %c0_i32_2 = arith.constant 0 : i32
    return %arg0, %c0_i32, %c0_i32_0, %c0_i32_1 : i32, i32, i32, i32
  }
  func.func @transform_2(%arg0: i32) -> (i32, i32, i32, i32) {
    %c0_i32 = arith.constant 0 : i32
    %c0_i32_0 = arith.constant 0 : i32
    %c0_i32_1 = arith.constant 0 : i32
    %c0_i32_2 = arith.constant 0 : i32
    return %arg0, %c0_i32, %c0_i32_0, %c0_i32_1 : i32, i32, i32, i32
  }
  func.func @transform_3(%arg0: i32) -> (i32, i32, i32, i32) {
    %c0_i32 = arith.constant 0 : i32
    %c0_i32_0 = arith.constant 0 : i32
    %c0_i32_1 = arith.constant 0 : i32
    %c0_i32_2 = arith.constant 0 : i32
    return %arg0, %c0_i32, %c0_i32_0, %c0_i32_1 : i32, i32, i32, i32
  }
  func.func @transform_4(%arg0: i32) -> (i32, i32) {
    %c0_i32 = arith.constant 0 : i32
    %c0_i32_0 = arith.constant 0 : i32
    %c0_i32_1 = arith.constant 0 : i32
    return %c0_i32, %c0_i32_0 : i32, i32
  }
  func.func @transform_5(%arg0: i32) -> (i32, i32) {
    %c0_i32 = arith.constant 0 : i32
    %c0_i32_0 = arith.constant 0 : i32
    %c0_i32_1 = arith.constant 0 : i32
    return %c0_i32, %c0_i32_0 : i32, i32
  }
  func.func @transform_6(%arg0: i32) -> (i32, i32) {
    %c0_i32 = arith.constant 0 : i32
    %c0_i32_0 = arith.constant 0 : i32
    %c0_i32_1 = arith.constant 0 : i32
    return %c0_i32, %c0_i32_0 : i32, i32
  }
  func.func @transform_7(%arg0: i32) -> (i32, i32) {
    %c0_i32 = arith.constant 0 : i32
    %c0_i32_0 = arith.constant 0 : i32
    %c0_i32_1 = arith.constant 0 : i32
    return %c0_i32, %c0_i32_0 : i32, i32
  }
  func.func @transform_8(%arg0: i32) -> (i32, i32) {
    %c0_i32 = arith.constant 0 : i32
    %c0_i32_0 = arith.constant 0 : i32
    %c0_i32_1 = arith.constant 0 : i32
    return %c0_i32, %c0_i32_0 : i32, i32
  }
  func.func @transform_9(%arg0: i32) -> (i32, i32) {
    %c0_i32 = arith.constant 0 : i32
    %c0_i32_0 = arith.constant 0 : i32
    %c0_i32_1 = arith.constant 0 : i32
    return %c0_i32, %c0_i32_0 : i32, i32
  }
  func.func @transform_10(%arg0: i32) -> (i32, i32, i32, i32) {
    %c0_i32 = arith.constant 0 : i32
    %c0_i32_0 = arith.constant 0 : i32
    %c0_i32_1 = arith.constant 0 : i32
    %c0_i32_2 = arith.constant 0 : i32
    return %arg0, %c0_i32, %c0_i32_0, %c0_i32_1 : i32, i32, i32, i32
  }
}

</mosaic_0001>

<bundles_post_ra>
// kernel: tpu_custom_call.1
= control target key start
LH: loop header
LB: loop body
LE: loop exit
PB: predicated region body
PF: predicated region fallthrough
CT: control target
= control target key end

     0   :  { %15 = vsyncpa [#allocation4], 0  ;;  %s4264_s0 = inlined_call_operand.vmem [shape: bf16[2,5,5,128], index: 0, kind: input, shape index: {}]   ;;  %s4265_s1 = inlined_call_operand.vmem [shape: bf16[2,5,5,128], index: 1, kind: input, shape index: {}]   ;;  %s4266_s2 = inlined_call_operand.vmem [shape: bf16[2,5,5,128], index: 2, kind: input, shape index: {}]   ;;  %s4267_s3 = inlined_call_operand.vmem [shape: bf16[2,5,5,128], index: 3, kind: input, shape index: {}]   ;;  %s4268_s4 = inlined_call_operand.hbm [shape: bf16[1152,128], index: 4, kind: input, shape index: {}]   ;;  %s4269_s5 = inlined_call_operand.vmem [shape: f32[1,128], index: 5, kind: input, shape index: {}]   ;;  %s4270_s6 = inlined_call_operand.hbm [shape: bf16[1152,128], index: 6, kind: input, shape index: {}]   ;;  %s4271_s7 = inlined_call_operand.vmem [shape: f32[1,128], index: 7, kind: input, shape index: {}]   ;;  %s4272_s8 = inlined_call_operand.vmem [shape: bf16[128,128], index: 8, kind: input, shape index: {}]   ;;  %s4273_s9 = inlined_call_operand.vmem [shape: f32[1,128], index: 9, kind: input, shape index: {}]   ;;  %s4274_s10 = inlined_call_operand.hbm [shape: bf16[2,4,4,128], index: 10, kind: output, shape index: {}]  }
   0x1   :  { %16 = vsyncpa [#allocation7], 0 }
   0x2   :  { %17 = vsyncpa [#allocation5], 0 }
   0x3   :  { %19 = vsyncpa [#allocation5 + $0x1], 0  ;;  %s3878_s13 = smov 0   ;;  %s3880_s14 = smov 0  }
   0x4   :  { %s3882_s15 = smov 0   ;;  %s3884_s16 = smov 0  }
   0x5 LB: > { %s3899_s17 = sadd.s32 4294967295, %s3814_s16   ;;  %s2816_s18 = sadd.s32 4294967294, %s3814_s16   ;;  %s3814_s16 = sphi %s3884_s16, %s4285_s16   ;;  %s3810_s15 = sphi %s3882_s15, %s4284_s15   ;;  %s3806_s14 = sphi %s3880_s14, %s4283_s14   ;;  %s3802_s13 = sphi %s3878_s13, %s4282_s13  }
   0x6   : > { %s3903_s19 = sadd.s32 1, %s3814_s16   ;;  %s262_s20 = sadd.s32 1, %s3810_s15 }
   0x7   : > { %s259_s21 = ssub.s32 %s3814_s16, %s3903_s19  ;;  %p272_p0 = scmp.ne.s32.totalorder %s3810_s15, %s3806_s14 }
   0x8   : > { %p260_p1 = scmp.eq.s32.totalorder %s259_s21, 0  ;;  %p273_p2 = scmp.eq.s32.totalorder %s3899_s17, 1 }
   0x9   : > { %p278_p3 = scmp.ne.s32.totalorder %s3806_s14, %s3802_s13  ;;  %p279_p4 = scmp.eq.s32.totalorder %s2816_s18, 1 }
   0xa   : > { %s3914_s22 = scalar_select %p260_p1, %s3810_s15, %s262_s20  }
   0xb   : > { %p3916_p5 = por %p273_p2, %p272_p0  ;;  %p3920_p6 = por %p279_p4, %p278_p3 }
   0xc   : > { %4275 = sst [smem:[#allocation12_spill]] %s3914_s22  ;;  %p2817_p7 = scmp.ge.s32.totalorder %s3814_s16, 1 }
   0xd   : > { %p286_p8 = scmp.lt.s32.totalorder %s3814_s16, 3  ;;  %p3637_p9 = scmp.eq.s32.totalorder %s3899_s17, 0 }
   0xe   : > { %s297_s28 = sshll.u32 %s4268_s4, 4  ;;  %s3816_s29 = smov [#allocation3]   ;;  %s298_s28 = int_to_ptr.hbm [resolvable:$true] %s297_s28 }
   0xf   : > { %p3927_p10 = pnand %p2817_p7, %p286_p8  ;;  %s299_s30 = sshll.u32 %s3816_s29, 4  ;;  %s300_s30 = int_to_ptr.vmem [resolvable:$true] %s299_s30 }
  0x10   : > { %s314_s18 = sshll.u32 %s4270_s6, 4  ;;  %s3817_s20 = smov 64   ;;  %s315_s18 = int_to_ptr.hbm [resolvable:$true] %s314_s18 }
  0x11   : > { %p3626_p11 = pneg %p3927_p10  ;;  %s3818_s21 = smov 4  }
  0x12   : > { %s3819_s22 = smov [#allocation6]   ;;  %373 = sbr.rel (%p3927_p10) target bundleno = 495 (0x1ef), region = 60 }
  0x13   : > { %p3627_p12 = pnand %p3637_p9, %p3626_p11  ;;  %s316_s26 = sshll.u32 %s3819_s22, 4  ;;  %s317_s26 = int_to_ptr.vmem [resolvable:$true] %s316_s26 }
  0x15   : > { %3629 = dma.hbm_to_vmem [thread:$0]  (!%p3627_p12), %s298_s28, 9216, %s300_s30, [#allocation4], %s3817_s20, %s3817_s20, %s3818_s21  }
  0x16   : > { %3632 = dma.hbm_to_vmem [thread:$0]  (!%p3627_p12), %s315_s18, 9216, %s317_s26, [#allocation7], %s3817_s20, %s3817_s20, %s3818_s21  }
  0x17   : > { %3789 = dma.done.wait (%p3637_p9), [#allocation4], 9216  }
  0x18   : > { %3791 = vsyncadd (%p3637_p9), [#allocation4], 4294958080 }
  0x19   : > { %3793 = dma.done.wait (%p3637_p9), [#allocation7], 9216  }
  0x1a   : > { %3795 = vsyncadd (%p3637_p9), [#allocation7], 4294958080  ;;  %v3469_v0 = vld [vmem:[#allocation3 + $0x38] sm:$0xff]  ;;  %v3468_v4 = vld [vmem:[#allocation3 + $0x30] sm:$0xff]  ;;  %p432_p13 = scmp.lt.s32.totalorder %s3899_s17, 1  ;;  %vm651_vm0 = vcmask 1041408  }
  0x1b   : > { %v3485_v1 = vld [vmem:[#allocation3 + $0xb8] sm:$0xff]  ;;  %1331 = vmatpush.bf16.msra.mxu0 %v3469_v0  ;;  %v3484_v5 = vld [vmem:[#allocation3 + $0xb0] sm:$0xff]  ;;  %v3467_v8 = vld [vmem:[#allocation3 + $0x28] sm:$0xff]  ;;  %vm655_vm1 = vcmask 1045508   ;;  %vm659_vm2 = vcmask 1043456   ;;  %vm1508_vm3 = vcmask 1042432  }
  0x1c   : > { %v3477_v2 = vld [vmem:[#allocation3 + $0x78] sm:$0xff]  ;;  %1359 = vmatpush.bf16.msra.mxu2 %v3485_v1  ;;  %v3476_v6 = vld [vmem:[#allocation3 + $0x70] sm:$0xff]  ;;  %v3483_v9 = vld [vmem:[#allocation3 + $0xa8] sm:$0xff]  ;;  %s433_s22 = scalar_select %p432_p13, %s3899_s17, 1  ;;  %vm1509_vm4 = vsmask.f32 2306 }
  0x1d   : > { %v3493_v3 = vld [vmem:[#allocation3 + $0xf8] sm:$0xff]  ;;  %1345 = vmatpush.bf16.msra.mxu1 %v3477_v2  ;;  %v3492_v7 = vld [vmem:[#allocation3 + $0xf0] sm:$0xff]  ;;  %v3475_v10 = vld [vmem:[#allocation3 + $0x68] sm:$0xff] }
  0x1e   : > { %1373 = vmatpush.bf16.msra.mxu3 %v3493_v3  ;;  %v3491_v11 = vld [vmem:[#allocation3 + $0xe8] sm:$0xff]  ;;  %v3466_v12 = vld [vmem:[#allocation3 + $0x20] sm:$0xff]  ;;  %s3953_s25 = smul.u32 20, %s433_s22  ;;  %v3465_v16 = vld [vmem:[#allocation3 + $0x18] sm:$0xff]  ;;  %s429_s22 = sand.u32 1, %s3806_s14  }
  0x1f   : > { %1332 = vmatpush.bf16.msra.mxu0 %v3468_v4  ;;  %v3482_v13 = vld [vmem:[#allocation3 + $0xa0] sm:$0xff]  ;;  %v3481_v17 = vld [vmem:[#allocation3 + $0x98] sm:$0xff]  ;;  %v3464_v20 = vld [vmem:[#allocation3 + $0x10] sm:$0xff] }
  0x20   : > { %1360 = vmatpush.bf16.msra.mxu2 %v3484_v5  ;;  %v3474_v14 = vld [vmem:[#allocation3 + $0x60] sm:$0xff]  ;;  %v3473_v18 = vld [vmem:[#allocation3 + $0x58] sm:$0xff]  ;;  %s3959_s29 = scalar_lea.vmem %s4264_s0, %s3953_s25  ;;  %v3480_v21 = vld [vmem:[#allocation3 + $0x90] sm:$0xff]  ;;  %s3965_s12 = scalar_lea.vmem %s4265_s1, %s3953_s25 }
  0x21   : > { %1346 = vmatpush.bf16.msra.mxu1 %v3476_v6  ;;  %v3490_v15 = vld [vmem:[#allocation3 + $0xe0] sm:$0xff]  ;;  %v3489_v19 = vld [vmem:[#allocation3 + $0xd8] sm:$0xff]  ;;  %v3472_v22 = vld [vmem:[#allocation3 + $0x50] sm:$0xff]  ;;  %s3972_s21 = scalar_lea.vmem %s4266_s2, %s3953_s25  ;;  %s4052_s27 = scalar_lea.vmem %s4267_s3, %s3953_s25 }
  0x22   : > { %1374 = vmatpush.bf16.msra.mxu3 %v3492_v7  ;;  %v3488_v23 = vld [vmem:[#allocation3 + $0xd0] sm:$0xff]  ;;  %v461_v24 = vld [vmem:[%s3959_s29] sm:$0x7]  ;;  %v462_v25 = vld [vmem:[%s3959_s29 + $0x4] sm:$0x7]  ;;  %s2824_s25 = sshll.u32 %s429_s22, 3 }
  0x23   : > { %1333 = vmatpush.bf16.msra.mxu0 %v3467_v8  ;;  %v463_v26 = vld [vmem:[%s3959_s29 + $0x8] sm:$0x7]  ;;  %v464_v27 = vld [vmem:[%s3959_s29 + $0xc] sm:$0x7]  ;;  %v495_v28 = vunpack.c.l.b16 %v461_v24  ;;  %v3978_v30 = vld [vmem:[%s3965_s12] sm:$0x3]  ;;  %v496_v31 = vunpack.c.l.b16 %v462_v25 }
  0x24   : > { %1361 = vmatpush.bf16.msra.mxu2 %v3483_v9  ;;  %v3463_v29 = vld [vmem:[#allocation3 + $0x8] sm:$0xff]  ;;  %v497_v32 = vunpack.c.l.b16 %v463_v26  ;;  %v498_v33 = vunpack.c.l.b16 %v464_v27  ;;  %v3981_v36 = vld [vmem:[%s3965_s12 + $0x4] sm:$0x3]  ;;  %v3986_v40 = vld [vmem:[%s3972_s21] sm:$0x3]  ;;  %v627_v48 = vrot.slane %v3978_v30, 6 }
  0x25   : > { %1347 = vmatpush.bf16.msra.mxu1 %v3475_v10  ;;  %v3479_v34 = vld [vmem:[#allocation3 + $0x88] sm:$0xff]  ;;  %v499_v37 = vpack.c.b16 %v495_v28, %v495_v28  ;;  %v500_v41 = vpack.c.b16 %v496_v31, %v496_v31  ;;  %v3989_v45 = vld [vmem:[%s3972_s21 + $0x4] sm:$0x3]  ;;  %v453_v51 = vld [vmem:[%s3959_s29] sm:$0x3]  ;;  %v633_v63 = vrot.slane %v3981_v36, 6 }
  0x26   : > { %1375 = vmatpush.bf16.msra.mxu3 %v3491_v11  ;;  %v3471_v35 = vld [vmem:[#allocation3 + $0x48] sm:$0xff]  ;;  %v501_v42 = vpack.c.b16 %v497_v32, %v497_v32  ;;  %v502_v43 = vpack.c.b16 %v498_v33, %v498_v33  ;;  %v3462_v49 = vld [vmem:[#allocation3] sm:$0xff]  ;;  %v3501_v58 = vld [vmem:[#allocation3 + $0x138] sm:$0xff]  ;;  %v629_v9 = vrot.slane %v3986_v40, 2  ;;  %v635_v10 = vrot.slane %v3989_v45, 2  ;;  %s431_s28 = scalar_lea.vmem [#allocation8], %s2824_s25 }
  0x27   : > { %1334 = vmatpush.bf16.msra.mxu0 %v3466_v12  ;;  %v459_v38 = vld [vmem:[%s3965_s12 + $0x8] sm:$0x3]  ;;  %v460_v39 = vld [vmem:[%s3965_s12 + $0xc] sm:$0x3]  ;;  %v504_v46 = vshrl.u32 %v499_v37, 16  ;;  %v506_v47 = vshll.u32 %v499_v37, 16  ;;  %vm4083_vm5 = vmand %vm1508_vm3, %vm1509_vm4 }
  0x28   : > { %1362 = vmatpush.bf16.msra.mxu2 %v3482_v13  ;;  %v3487_v44 = vld [vmem:[#allocation3 + $0xc8] sm:$0xff]  ;;  %v3478_v50 = vld [vmem:[#allocation3 + $0x80] sm:$0xff]  ;;  %v511_v54 = vshrl.u32 %v500_v41, 16  ;;  %v513_v55 = vshll.u32 %v500_v41, 16  ;;  %v518_v56 = vshrl.u32 %v501_v42, 16  ;;  %v520_v57 = vshll.u32 %v501_v42, 16 }
  0x29   : > { %1348 = vmatpush.bf16.msra.mxu1 %v3474_v14  ;;  %v454_v52 = vld [vmem:[%s3959_s29 + $0x4] sm:$0x3]  ;;  %v3995_v53 = vld [vmem:[%s3972_s21 + $0x8] sm:$0x3]  ;;  %v3998_v59 = vld [vmem:[%s3972_s21 + $0xc] sm:$0x3] }
  0x2a   : > { %1376 = vmatpush.bf16.msra.mxu3 %v3490_v15  ;;  %v508_v60 = vrot.slane %v506_v47, 1  ;;  %v525_v61 = vshrl.u32 %v502_v43, 16  ;;  %v527_v62 = vshll.u32 %v502_v43, 16  ;;  %v455_v0 = vld [vmem:[%s3959_s29 + $0x8] sm:$0x3]  ;;  %v515_v1 = vrot.slane %v513_v55, 1 }
  0x2b   : > { %1335 = vmatpush.bf16.msra.mxu0 %v3465_v16  ;;  %v522_v2 = vrot.slane %v520_v57, 1  ;;  %v639_v3 = vrot.slane %v459_v38, 6  ;;  %v645_v4 = vrot.slane %v460_v39, 6  ;;  %v3517_v5 = vld [vmem:[#allocation3 + $0x1b8] sm:$0xff]  ;;  %v456_v6 = vld [vmem:[%s3959_s29 + $0xc] sm:$0x3] }
  0x2c   : > { %1363 = vmatpush.bf16.msra.mxu2 %v3481_v17  ;;  %v509_v7 = vor.u32 %v508_v60, %v504_v46  ;;  %v529_v8 = vrot.slane %v527_v62, 1  ;;  %v3470_v11 = vld [vmem:[#allocation3 + $0x40] sm:$0xff]  ;;  %v516_v13 = vor.u32 %v515_v1, %v511_v54  ;;  %v641_v15 = vrot.slane %v3995_v53, 2  ;;  %v3509_v17 = vld [vmem:[#allocation3 + $0x178] sm:$0xff]  ;;  %v3516_v30 = vld [vmem:[#allocation3 + $0x1b0] sm:$0xff] }
  0x2d   : > { %1349 = vmatpush.bf16.msra.mxu1 %v3473_v18  ;;  %v3486_v12 = vld [vmem:[#allocation3 + $0xc0] sm:$0xff]  ;;  %v523_v14 = vor.u32 %v522_v2, %v518_v56  ;;  %v647_v16 = vrot.slane %v3998_v59, 2  ;;  %v3525_v18 = vld [vmem:[#allocation3 + $0x1f8] sm:$0xff]  ;;  %v684_v26 = vsel %vm651_vm0, %v455_v0, %v639_v3  ;;  %v698_v27 = vsel %vm651_vm0, %v456_v6, %v645_v4  ;;  %v475_v33 = vld [vmem:[%s3972_s21 + $0x8] sm:$0x7] }
  0x2e   : > { %1377 = vmatpush.bf16.msra.mxu3 %v3489_v19  ;;  %v3500_v19 = vld [vmem:[#allocation3 + $0x130] sm:$0xff]  ;;  %v634_v24 = vrot.slane %v516_v13, 4  ;;  %v473_v28 = vld [vmem:[%s3972_s21] sm:$0x7]  ;;  %v4020_v42 = vld [vmem:[%s3959_s29 + $0x4] sm:$0x3]  ;;  %v537_v43 = vunpack.c.l.b16 %v475_v33 }
  0x2f   : > { %1336 = vmatpush.bf16.msra.mxu0 %v3464_v20  ;;  %v530_v20 = vor.u32 %v529_v8, %v525_v61  ;;  %v640_v25 = vrot.slane %v523_v14, 4  ;;  %v3508_v37 = vld [vmem:[#allocation3 + $0x170] sm:$0xff]  ;;  %v3515_v45 = vld [vmem:[#allocation3 + $0x1a8] sm:$0xff]  ;;  %v631_v61 = vrot.slane %v4020_v42, 4  ;;  %v3498_v13 = vld [vmem:[#allocation3 + $0x120] sm:$0xff] }
  0x30   : > { %1364 = vmatpush.bf16.msra.mxu2 %v3480_v21  ;;  %v628_v21 = vrot.slane %v509_v7, 4  ;;  %v3524_v38 = vld [vmem:[#allocation3 + $0x1f0] sm:$0xff]  ;;  %v673_v40 = vsel %vm655_vm1, %v634_v24, %v635_v10  ;;  %v4036_v53 = vld [vmem:[%s3965_s12 + $0x8] sm:$0x3]  ;;  %v4042_v59 = vld [vmem:[%s3965_s12 + $0xc] sm:$0x3]  ;;  %v541_v60 = vpack.c.b16 %v537_v43, %v537_v43 }
  0x31   : > { %1350 = vmatpush.bf16.msra.mxu1 %v3472_v22  ;;  %v654_v22 = vsel %vm651_vm0, %v453_v51, %v627_v48  ;;  %v646_v31 = vrot.slane %v530_v20, 4  ;;  %v687_v41 = vsel %vm655_vm1, %v640_v25, %v641_v15  ;;  %v3507_v57 = vld [vmem:[#allocation3 + $0x168] sm:$0xff]  ;;  %v2836_v4 = vld [vmem:[%s3965_s12 + $0x10] sm:$0x3]  ;;  %v3514_v14 = vld [vmem:[#allocation3 + $0x1a0] sm:$0xff] }
  0x32   : > { %1378 = vmatpush.bf16.msra.mxu3 %v3488_v23  ;;  %v670_v23 = vsel %vm651_vm0, %v454_v52, %v633_v63  ;;  %v658_v32 = vsel %vm655_vm1, %v628_v21, %v629_v9  ;;  %v688_v47 = vsel %vm659_vm2, %v684_v26, %v687_v41  ;;  %v4033_v52 = vld [vmem:[%s3959_s29 + $0xc] sm:$0x3]  ;;  %v558_v6 = vshrl.u32 %v541_v60, 16  ;;  %v3522_v20 = vld [vmem:[#allocation3 + $0x1e0] sm:$0xff]  ;;  %v3497_v25 = vld [vmem:[#allocation3 + $0x118] sm:$0xff] }
  0x33   : > { %1337 = vmatpush.bf16.msra.mxu0 %v3463_v29  ;;  %v474_v29 = vld [vmem:[%s3972_s21 + $0x4] sm:$0x7]  ;;  %v660_v39 = vsel %vm659_vm2, %v654_v22, %v658_v32  ;;  %v674_v46 = vsel %vm659_vm2, %v670_v23, %v673_v40  ;;  %v701_v48 = vsel %vm655_vm1, %v646_v31, %v647_v16  ;;  %862 = vst [vmem:[#allocation1 + $0x2] ss:$4 sm:$0xff] %v688_v47  ;;  %v3523_v63 = vld [vmem:[#allocation3 + $0x1e8] sm:$0xff]  ;;  %v560_v7 = vshll.u32 %v541_v60, 16 }
  0x34   : > { %1365 = vmatpush.bf16.msra.mxu2 %v3479_v34  ;;  %v476_v34 = vld [vmem:[%s3972_s21 + $0xc] sm:$0x7]  ;;  %v536_v36 = vunpack.c.l.b16 %v474_v29  ;;  %858 = vst [vmem:[#allocation1] ss:$4 sm:$0xff] %v660_v39  ;;  %v702_v51 = vsel %vm659_vm2, %v698_v27, %v701_v48  ;;  %v650_v24 = vrot.slane %v2836_v4, 2  ;;  %v3513_v31 = vld [vmem:[#allocation3 + $0x198] sm:$0xff] }
  0x35   : > { %1351 = vmatpush.bf16.msra.mxu1 %v3471_v35  ;;  %v535_v35 = vunpack.c.l.b16 %v473_v28  ;;  %860 = vst [vmem:[#allocation1 + $0x1] ss:$4 sm:$0xff] %v674_v46  ;;  %v538_v54 = vunpack.c.l.b16 %v476_v34  ;;  %v562_v16 = vrot.slane %v560_v7, 1  ;;  %v469_v26 = vld [vmem:[%s4052_s27] sm:$0x3]  ;;  %v3505_v42 = vld [vmem:[#allocation3 + $0x158] sm:$0xff] }
  0x36   : > { %1379 = vmatpush.bf16.msra.mxu3 %v3487_v44  ;;  %v3499_v44 = vld [vmem:[#allocation3 + $0x128] sm:$0xff]  ;;  %v540_v56 = vpack.c.b16 %v536_v36, %v536_v36  ;;  %864 = vst [vmem:[#allocation1 + $0x3] ss:$4 sm:$0xff] %v702_v51  ;;  %v2837_v29 = vld [vmem:[%s3959_s29 + $0x4] sm:$0x7]  ;;  %v3520_v7 = vld [vmem:[#allocation3 + $0x1d0] sm:$0xff] }
  0x37   : > { %1338 = vmatpush.bf16.msra.mxu0 %v3462_v49  ;;  %v4026_v49 = vld [vmem:[%s3959_s29 + $0x8] sm:$0x3]  ;;  %v539_v55 = vpack.c.b16 %v535_v35, %v535_v35  ;;  %v542_v0 = vpack.c.b16 %v538_v54, %v538_v54  ;;  %v563_v28 = vor.u32 %v562_v16, %v558_v6  ;;  %v470_v32 = vld [vmem:[%s4052_s27 + $0x4] sm:$0x3]  ;;  %v472_v34 = vld [vmem:[%s4052_s27 + $0xc] sm:$0x3] }
  0x38   : > { %1366 = vmatpush.bf16.msra.mxu2 %v3478_v50  ;;  %v4029_v50 = vld [vmem:[%s3965_s12 + $0x4] sm:$0x3]  ;;  %v551_v3 = vshrl.u32 %v540_v56, 16  ;;  %v637_v8 = vrot.slane %v4026_v49, 4  ;;  %v471_v33 = vld [vmem:[%s4052_s27 + $0x8] sm:$0x3] }
  0x39   : > { %1352 = vmatpush.bf16.msra.mxu1 %v3470_v11  ;;  %v632_v62 = vrot.slane %v4029_v50, 2  ;;  %v544_v1 = vshrl.u32 %v539_v55, 16  ;;  %v546_v2 = vshll.u32 %v539_v55, 16  ;;  %v565_v10 = vshrl.u32 %v542_v0, 16  ;;  %v2840_v39 = vld [vmem:[%s3959_s29 + $0x10] sm:$0x7] }
  0x3a   : > { %1380 = vmatpush.bf16.msra.mxu3 %v3486_v12  ;;  %v567_v11 = vshll.u32 %v542_v0, 16  ;;  %v638_v12 = vrot.slane %v4036_v53, 2  ;;  %v3521_v53 = vld [vmem:[#allocation3 + $0x1d8] sm:$0xff]  ;;  %v642_v55 = vrot.slane %v563_v28, 6  ;;  %v3504_v6 = vld [vmem:[#allocation3 + $0x150] sm:$0xff]  ;;  %v3510_v28 = vld [vmem:[#allocation3 + $0x180] sm:$0xff] }
  0x3b   : > { %1387 = vmatpush.bf16.msrb.mxu0 %v3501_v58  ;;  %v4039_v58 = vld [vmem:[%s3959_s29 + $0x10] sm:$0x3]  ;;  %v548_v9 = vrot.slane %v546_v2, 1  ;;  %s2693_s12 = sshll.u32 %s431_s28, 4  ;;  %s2694_s12 = int_to_ptr.vmem [resolvable:$true] %s2693_s12 }
  0x3c   : > { %1415 = vmatpush.bf16.msrb.mxu2 %v3517_v5  ;;  %v553_v5 = vshll.u32 %v540_v56, 16  ;;  %v569_v22 = vrot.slane %v567_v11, 1  ;;  %v649_v23 = vrot.slane %v4039_v58, 4  ;;  %v680_v43 = vsel %vm655_vm1, %v637_v8, %v638_v12 }
  0x3d   : > { %1401 = vmatpush.bf16.msrb.mxu1 %v3509_v17  ;;  %v643_v17 = vrot.slane %v4033_v52, 4  ;;  %v549_v21 = vor.u32 %v548_v9, %v544_v1  ;;  %v873_v40 = vld.sshfl [vmem:[#allocation1] sm:$0xff pattern:$0x73625140]  ;;  %v578_v52 = vunpack.c.l.b16 %v2840_v39  ;;  %v691_v0 = vsel %vm651_vm0, %v471_v33, %v642_v55 }
  0x3e   : > { %1429 = vmatpush.bf16.msrb.mxu3 %v3525_v18  ;;  %v555_v15 = vrot.slane %v553_v5, 1  ;;  %v644_v18 = vrot.slane %v4042_v59, 2  ;;  %v570_v35 = vor.u32 %v569_v22, %v565_v10  ;;  %v875_v41 = vld.sshfl [vmem:[#allocation1 + $0x10] sm:$0xff pattern:$0x73625140]  ;;  %1339 = vmatmul.bf16.vlgmr.msra.gmra.mxu0 %v873_v40  ;;  %v708_v51 = vsel %vm655_vm1, %v649_v23, %v650_v24  ;;  %v3519_v22 = vld [vmem:[#allocation3 + $0x1c8] sm:$0xff] }
  0x3f   : > { %1388 = vmatpush.bf16.msrb.mxu0 %v3500_v19  ;;  %v3506_v19 = vld [vmem:[#allocation3 + $0x160] sm:$0xff]  ;;  %v630_v36 = vrot.slane %v549_v21, 6  ;;  %1367 = vmatmul.bf16.vlgmr.msra.gmra.mxu2 %v875_v41  ;;  %v874_v47 = vld.sshfl [vmem:[#allocation1 + $0x8] sm:$0xff pattern:$0x73625140]  ;;  %v582_v5 = vpack.c.b16 %v578_v52, %v578_v52  ;;  %v3529_v40 = vld [vmem:[#allocation3 + $0x218] sm:$0xff] }
  0x40   : > { %1416 = vmatpush.bf16.msrb.mxu2 %v3516_v30  ;;  %v556_v27 = vor.u32 %v555_v15, %v551_v3  ;;  %v2838_v30 = vld [vmem:[%s3959_s29 + $0x8] sm:$0x7]  ;;  %v876_v48 = vld.sshfl [vmem:[#allocation1 + $0x18] sm:$0xff pattern:$0x73625140]  ;;  %v694_v50 = vsel %vm655_vm1, %v643_v17, %v644_v18  ;;  %v648_v56 = vrot.slane %v570_v35, 6  ;;  %1353 = vmatmul.bf16.vlgmr.msra.gmra.mxu1 %v874_v47 }
  0x41   : > { %1402 = vmatpush.bf16.msrb.mxu1 %v3508_v37  ;;  %v666_v37 = vsel %vm655_vm1, %v631_v61, %v632_v62  ;;  %v663_v49 = vsel %vm651_vm0, %v469_v26, %v630_v36  ;;  %1381 = vmatmul.bf16.vlgmr.msra.gmra.mxu3 %v876_v48  ;;  %v3496_v61 = vld [vmem:[#allocation3 + $0x110] sm:$0xff]  ;;  %v695_v3 = vsel %vm659_vm2, %v691_v0, %v694_v50  ;;  %v3511_v15 = vld [vmem:[#allocation3 + $0x188] sm:$0xff]  ;;  %v607_v17 = vshll.u32 %v582_v5, 16  ;;  %v3530_v39 = vld [vmem:[#allocation3 + $0x220] sm:$0xff] }
  0x42   : > { %1430 = vmatpush.bf16.msrb.mxu3 %v3524_v38  ;;  %v2839_v38 = vld [vmem:[%s3959_s29 + $0xc] sm:$0x7]  ;;  %v636_v54 = vrot.slane %v556_v27, 6  ;;  %v3512_v62 = vld [vmem:[#allocation3 + $0x190] sm:$0xff]  ;;  %v705_v1 = vsel %vm651_vm0, %v472_v34, %v648_v56  ;;  %870 = vst [vmem:[#allocation1 + $0x22] ss:$4 sm:$0xff] %v695_v3 }
  0x43   : > { %1389 = vmatpush.bf16.msrb.mxu0 %v3499_v44  ;;  %v575_v44 = vunpack.c.l.b16 %v2837_v29  ;;  %v577_v46 = vunpack.c.l.b16 %v2839_v38  ;;  %v709_v4 = vsel %vm659_vm2, %v705_v1, %v708_v51  ;;  %v3503_v21 = vld [vmem:[#allocation3 + $0x148] sm:$0xff]  ;;  %v609_v24 = vrot.slane %v607_v17, 1  ;;  %v3494_v27 = vld [vmem:[#allocation3 + $0x100] sm:$0xff]  ;;  %v3533_v29 = vld [vmem:[#allocation3 + $0x238] sm:$0xff] }
  0x44   : > { %1417 = vmatpush.bf16.msrb.mxu2 %v3515_v45  ;;  %v576_v45 = vunpack.c.l.b16 %v2838_v30  ;;  %872 = vst [vmem:[#allocation1 + $0x23] ss:$4 sm:$0xff] %v709_v4  ;;  %v3532_v35 = vld [vmem:[#allocation3 + $0x230] sm:$0xff]  ;;  %v3531_v38 = vld [vmem:[#allocation3 + $0x228] sm:$0xff]  ;;  %v3681_v50 = vld [vmem:[%s4269_s5] ss:$0 sm:$0xff] }
  0x45   : > { %1403 = vmatpush.bf16.msrb.mxu1 %v3507_v57  ;;  %v667_v57 = vsel %vm659_vm2, %v663_v49, %v666_v37  ;;  %v579_v58 = vpack.c.b16 %v575_v44, %v575_v44  ;;  %v581_v60 = vpack.c.b16 %v577_v46, %v577_v46  ;;  %v3528_v41 = vld [vmem:[#allocation3 + $0x210] sm:$0xff]  ;;  %v3549_v46 = vld [vmem:[#allocation6 + $0x78] sm:$0xff]  ;;  %v3820_v55 = vmov 0   ;;  %v3538_v3 = vld [vmem:[#allocation6 + $0x20] sm:$0xff] }
  0x46   : > { %1431 = vmatpush.bf16.msrb.mxu3 %v3523_v63  ;;  %866 = vst [vmem:[#allocation1 + $0x20] ss:$4 sm:$0xff] %v667_v57  ;;  %v580_v59 = vpack.c.b16 %v576_v45, %v576_v45  ;;  %v677_v63 = vsel %vm651_vm0, %v470_v32, %v636_v54  ;;  %v3518_v32 = vld [vmem:[#allocation3 + $0x1c0] sm:$0xff]  ;;  %v3541_v45 = vld [vmem:[#allocation6 + $0x38] sm:$0xff]  ;;  %v3540_v47 = vld [vmem:[#allocation6 + $0x30] sm:$0xff] }
  0x47   : > { %1390 = vmatpush.bf16.msrb.mxu0 %v3498_v13  ;;  %v681_v2 = vsel %vm659_vm2, %v677_v63, %v680_v43  ;;  %v584_v8 = vshrl.u32 %v579_v58, 16  ;;  %v586_v9 = vshll.u32 %v579_v58, 16  ;;  %v598_v12 = vshrl.u32 %v581_v60, 16  ;;  %v3526_v43 = vld [vmem:[#allocation3 + $0x200] sm:$0xff]  ;;  %v3548_v48 = vld [vmem:[#allocation6 + $0x70] sm:$0xff]  ;;  %v3537_v17 = vld [vmem:[#allocation6 + $0x18] sm:$0xff] }
  0x48   : > { %1418 = vmatpush.bf16.msrb.mxu2 %v3514_v14  ;;  %868 = vst [vmem:[#allocation1 + $0x21] ss:$4 sm:$0xff] %v681_v2  ;;  %v591_v10 = vshrl.u32 %v580_v59, 16  ;;  %v593_v11 = vshll.u32 %v580_v59, 16  ;;  %v600_v13 = vshll.u32 %v581_v60, 16  ;;  %v3495_v14 = vld [vmem:[#allocation3 + $0x108] sm:$0xff] }
  0x49   : > { %1404 = vmatpush.bf16.msrb.mxu1 %v3506_v19  ;;  %v588_v16 = vrot.slane %v586_v9, 1  ;;  %1459 = vst [vmem:[#allocation2] sm:$0x7] %v3820_v55  ;;  %v3546_v4 = vld [vmem:[#allocation6 + $0x60] sm:$0xff] }
  0x4a   : > { %1432 = vmatpush.bf16.msrb.mxu3 %v3522_v20  ;;  %v595_v18 = vrot.slane %v593_v11, 1  ;;  %v602_v19 = vrot.slane %v600_v13, 1  ;;  %v605_v20 = vshrl.u32 %v582_v5, 16  ;;  %1460 = vst [vmem:[#allocation2 + $0x4] sm:$0x7] %v3820_v55  ;;  %v3565_v13 = vld [vmem:[#allocation6 + $0xf8] sm:$0xff] }
  0x4b   : > { %1391 = vmatpush.bf16.msrb.mxu0 %v3497_v25  ;;  %v589_v23 = vor.u32 %v588_v16, %v584_v8  ;;  %1461 = vst [vmem:[#allocation2 + $0x8] sm:$0x7] %v3820_v55 }
  0x4c   : > { %1419 = vmatpush.bf16.msrb.mxu2 %v3513_v31  ;;  %v596_v25 = vor.u32 %v595_v18, %v591_v10  ;;  %v603_v26 = vor.u32 %v602_v19, %v598_v12  ;;  %v610_v30 = vor.u32 %v609_v24, %v605_v20  ;;  %v3502_v31 = vld [vmem:[#allocation3 + $0x140] sm:$0xff]  ;;  %1464 = vst [vmem:[#allocation2 + $0x14] sm:$0x7] %v3820_v55  ;;  %v3557_v12 = vld [vmem:[#allocation6 + $0xb8] sm:$0xff]  ;;  %v3556_v19 = vld [vmem:[#allocation6 + $0xb0] sm:$0xff] }
  0x4d   : > { %1405 = vmatpush.bf16.msrb.mxu1 %v3505_v42  ;;  %882 = vst [vmem:[#allocation1] ss:$4 sm:$0xff] %v589_v23  ;;  %v3527_v42 = vld [vmem:[#allocation3 + $0x208] sm:$0xff]  ;;  %v3545_v18 = vld [vmem:[#allocation6 + $0x58] sm:$0xff]  ;;  %v3564_v20 = vld [vmem:[#allocation6 + $0xf0] sm:$0xff] }
  0x4e   : > { %1433 = vmatpush.bf16.msrb.mxu3 %v3521_v53  ;;  %884 = vst [vmem:[#allocation1 + $0x1] ss:$4 sm:$0xff] %v596_v25  ;;  %v3536_v25 = vld [vmem:[#allocation6 + $0x10] sm:$0xff] }
  0x4f   : > { %1392 = vmatpush.bf16.msrb.mxu0 %v3496_v61  ;;  %886 = vst [vmem:[#allocation1 + $0x2] ss:$4 sm:$0xff] %v603_v26  ;;  %v877_v33 = vld.sshfl [vmem:[#allocation1 + $0x20] sm:$0xff pattern:$0x73625140]  ;;  %v3539_v61 = vld [vmem:[#allocation6 + $0x28] sm:$0xff] }
  0x50   : > { %1420 = vmatpush.bf16.msrb.mxu2 %v3512_v62  ;;  %v879_v34 = vld.sshfl [vmem:[#allocation1 + $0x30] sm:$0xff pattern:$0x73625140]  ;;  %888 = vst [vmem:[#allocation1 + $0x3] ss:$4 sm:$0xff] %v610_v30  ;;  %v3547_v62 = vld [vmem:[#allocation6 + $0x68] sm:$0xff] }
  0x51   : > { %1406 = vmatpush.bf16.msrb.mxu1 %v3504_v6  ;;  %v878_v36 = vld.sshfl [vmem:[#allocation1 + $0x28] sm:$0xff pattern:$0x73625140]  ;;  %v880_v37 = vld.sshfl [vmem:[#allocation1 + $0x38] sm:$0xff pattern:$0x73625140] }
  0x52   : > { %1434 = vmatpush.bf16.msrb.mxu3 %v3520_v7  ;;  %1462 = vst [vmem:[#allocation2 + $0xc] sm:$0x7] %v3820_v55  ;;  %v3544_v26 = vld [vmem:[#allocation6 + $0x50] sm:$0xff]  ;;  %v3555_v30 = vld [vmem:[#allocation6 + $0xa8] sm:$0xff] }
  0x53   : > { %1393 = vmatpush.bf16.msrb.mxu0 %v3495_v14  ;;  %1463 = vst [vmem:[#allocation2 + $0x10] sm:$0x7] %v3820_v55 }
  0x54   : > { %1421 = vmatpush.bf16.msrb.mxu2 %v3511_v15 }
  0x55   : > { %1407 = vmatpush.bf16.msrb.mxu1 %v3503_v21 }
  0x56   : > { %1435 = vmatpush.bf16.msrb.mxu3 %v3519_v22  ;;  %v1527_v22 = vld [vmem:[#allocation2] sm:$0x7] }
  0x57   : > { %1394 = vmatpush.bf16.msrb.mxu0 %v3494_v27  ;;  %v889_v44 = vld.sshfl [vmem:[#allocation1] sm:$0xff pattern:$0x73625140] }
  0x58   : > { %1422 = vmatpush.bf16.msrb.mxu2 %v3510_v28 }
  0x59   : > { %1408 = vmatpush.bf16.msrb.mxu1 %v3502_v31  ;;  %v3563_v31 = vld [vmem:[#allocation6 + $0xe8] sm:$0xff] }
  0x5a   : > { %1436 = vmatpush.bf16.msrb.mxu3 %v3518_v32  ;;  %1395 = vmatmul.bf16.vlgmr.msrb.gmra.mxu0 %v877_v33 }
  0x5b   : > { %1443 = vmatpush.bf16.msra.mxu0 %v3533_v29  ;;  %1423 = vmatmul.bf16.vlgmr.msrb.gmra.mxu2 %v879_v34  ;;  %v1564_v29 = vunpack.c.l.b16 %v1527_v22 }
  0x5c   : > { %1409 = vmatmul.bf16.vlgmr.msrb.gmra.mxu1 %v878_v36  ;;  %2451 = vmatpush.bf16.msra.mxu2 %v3549_v46  ;;  %v3535_v36 = vld [vmem:[#allocation6 + $0x8] sm:$0xff] }
  0x5d   : > { %1437 = vmatmul.bf16.vlgmr.msrb.gmra.mxu3 %v880_v37  ;;  %2437 = vmatpush.bf16.msra.mxu1 %v3541_v45  ;;  %v3543_v37 = vld [vmem:[#allocation6 + $0x48] sm:$0xff] }
  0x5e   : > { %2465 = vmatpush.bf16.msra.mxu3 %v3557_v12  ;;  %v3580_v12 = vld [vmem:[#allocation6 + $0x170] sm:$0xff] }
  0x5f   : > { %1444 = vmatpush.bf16.msra.mxu0 %v3532_v35 }
  0x60   : > { %2452 = vmatpush.bf16.msra.mxu2 %v3548_v48  ;;  %v3542_v48 = vld [vmem:[#allocation6 + $0x40] sm:$0xff] }
  0x61   : > { %2438 = vmatpush.bf16.msra.mxu1 %v3540_v47  ;;  %v3534_v47 = vld [vmem:[#allocation6] sm:$0xff] }
  0x62   : > { %2466 = vmatpush.bf16.msra.mxu3 %v3556_v19  ;;  %v3551_v19 = vld [vmem:[#allocation6 + $0x88] sm:$0xff] }
  0x63   : > { %1445 = vmatpush.bf16.msra.mxu0 %v3531_v38 }
  0x64   : > { %2453 = vmatpush.bf16.msra.mxu2 %v3547_v62 }
  0x65   : > { %2439 = vmatpush.bf16.msra.mxu1 %v3539_v61  ;;  %v1514_v61 = vld [vmem:[#allocation2 + $0x8] sm:$0x7] }
  0x66   : > { %2467 = vmatpush.bf16.msra.mxu3 %v3555_v30 }
  0x67   : > { %1446 = vmatpush.bf16.msra.mxu0 %v3530_v39  ;;  %v1568_v39 = vpack.c.b16 %v1564_v29, %v1564_v29 }
  0x68   : > { %2454 = vmatpush.bf16.msra.mxu2 %v3546_v4 }
  0x69   : > { %2440 = vmatpush.bf16.msra.mxu1 %v3538_v3  ;;  %v1573_v3 = vshrl.u32 %v1568_v39, 16 }
  0x6b   : > { %1447 = vmatpush.bf16.msra.mxu0 %v3529_v40  ;;  %v3554_v40 = vld [vmem:[#allocation6 + $0xa0] sm:$0xff] }
  0x6c   : > { %2455 = vmatpush.bf16.msra.mxu2 %v3545_v18  ;;  %2468 = vmatpush.bf16.msra.mxu3 %v3554_v40 }
  0x6d   : > { %2441 = vmatpush.bf16.msra.mxu1 %v3537_v17  ;;  %v1555_v17 = vld [vmem:[#allocation2 + $0x14] sm:$0x7] }
  0x6f   : > { %1448 = vmatpush.bf16.msra.mxu0 %v3528_v41  ;;  %v3562_v41 = vld [vmem:[#allocation6 + $0xe0] sm:$0xff] }
  0x70   : > { %2456 = vmatpush.bf16.msra.mxu2 %v3544_v26  ;;  %v1559_v26 = vld [vmem:[#allocation2 + $0x14] sm:$0x6] }
  0x71   : > { %2442 = vmatpush.bf16.msra.mxu1 %v3536_v25  ;;  %v3579_v25 = vld [vmem:[#allocation6 + $0x168] sm:$0xff] }
  0x73   : > { %1449 = vmatpush.bf16.msra.mxu0 %v3527_v42 }
  0x74   : > { %2457 = vmatpush.bf16.msra.mxu2 %v3543_v37  ;;  %v1523_v37 = vld [vmem:[#allocation2] sm:$0x3] }
  0x75   : > { %2443 = vmatpush.bf16.msra.mxu1 %v3535_v36  ;;  %v3570_v36 = vld [vmem:[#allocation6 + $0x120] sm:$0xff] }
  0x77   : > { %1450 = vmatpush.bf16.msra.mxu0 %v3526_v43 }
  0x78   : > { %2458 = vmatpush.bf16.msra.mxu2 %v3542_v48 }
  0x79   : > { %2444 = vmatpush.bf16.msra.mxu1 %v3534_v47 }
  0x7a   : > { %1451 = vmatmul.bf16.vlgmr.msra.gmra.mxu0 %v889_v44 }
  0x7b   : > { %2479 = vmatpush.bf16.msrb.mxu0 %v3565_v13 }
  0x7f   : > { %2480 = vmatpush.bf16.msrb.mxu0 %v3564_v20  ;;  %v3559_v20 = vld [vmem:[#allocation6 + $0xc8] sm:$0xff] }
  0x83   : > { %2481 = vmatpush.bf16.msrb.mxu0 %v3563_v31 }
  0x87   : > { %2482 = vmatpush.bf16.msrb.mxu0 %v3562_v41  ;;  %v1520_v41 = vld [vmem:[#allocation2 + $0x10] sm:$0x7] }
  0xbb   : > { %v1340_v49 = vpop.f32.mrf.mxu0 }
  0xbc   : > { %v1341_v53 = vadd.f32 %v3681_v50, %v1340_v49  ;;  %v1575_v49 = vshll.u32 %v1568_v39, 16  ;;  %v1719_v39 = vunpack.c.l.b16 %v1559_v26 }
  0xbd   : > { %v1354_v51 = vpop.f32.mrf.mxu1 }
  0xbe   : > { %v1355_v57 = vadd.f32 %v1354_v51, %v1341_v53  ;;  %v3553_v51 = vld [vmem:[#allocation6 + $0x98] sm:$0xff]  ;;  %v1577_v4 = vrot.slane %v1575_v49, 1 }
  0xbf   : > { %v3573_v53 = vld [vmem:[#allocation6 + $0x138] sm:$0xff]  ;;  %2469 = vmatpush.bf16.msra.mxu3 %v3553_v51 }
  0xc0   : > { %2493 = vmatpush.bf16.msrb.mxu1 %v3573_v53  ;;  %v1578_v18 = vor.u32 %v1577_v4, %v1573_v3 }
  0xc2   : > { %v1368_v52 = vpop.f32.mrf.mxu2 }
  0xc3   : > { %v1342_v54 = vpop.f32.mrf.mxu0  ;;  %v1369_v59 = vadd.f32 %v1368_v52, %v1355_v57  ;;  %v3561_v52 = vld [vmem:[#allocation6 + $0xd8] sm:$0xff] }
  0xc4   : > { %v1382_v56 = vpop.f32.mrf.mxu3  ;;  %v1343_v0 = vadd.f32 %v3681_v50, %v1342_v54  ;;  %2483 = vmatpush.bf16.msrb.mxu0 %v3561_v52 }
  0xc5   : > { %v1356_v58 = vpop.f32.mrf.mxu1  ;;  %v1383_v1 = vadd.f32 %v1382_v56, %v1369_v59 }
  0xc6   : > { %v1357_v5 = vadd.f32 %v1356_v58, %v1343_v0  ;;  %v3581_v58 = vld [vmem:[#allocation6 + $0x178] sm:$0xff] }
  0xc7   : > { %2507 = vmatpush.bf16.msrb.mxu2 %v3581_v58 }
  0xca   : > { %v1370_v60 = vpop.f32.mrf.mxu2 }
  0xcb   : > { %v1371_v9 = vadd.f32 %v1370_v60, %v1357_v5  ;;  %v1511_v60 = vld [vmem:[#allocation2 + $0x4] sm:$0x7]  ;;  %v3552_v5 = vld [vmem:[#allocation6 + $0x90] sm:$0xff]  ;;  %2508 = vmatpush.bf16.msrb.mxu2 %v3580_v12  ;;  %v3569_v12 = vld [vmem:[#allocation6 + $0x118] sm:$0xff] }
  0xcc   : > { %v1384_v2 = vpop.f32.mrf.mxu3  ;;  %2470 = vmatpush.bf16.msra.mxu3 %v3552_v5  ;;  %v3578_v5 = vld [vmem:[#allocation6 + $0x160] sm:$0xff] }
  0xcd   : > { %v1385_v15 = vadd.f32 %v1384_v2, %v1371_v9 }
  0xcf   : > { %2509 = vmatpush.bf16.msrb.mxu2 %v3579_v25 }
  0xd0   : > { %2471 = vmatpush.bf16.msra.mxu3 %v3551_v19 }
  0xd3   : > { %2510 = vmatpush.bf16.msrb.mxu2 %v3578_v5 }
  0xd7   : > { %v1396_v63 = vpop.f32.mrf.mxu0 }
  0xd8   : > { %v1397_v6 = vadd.f32 %v1396_v63, %v1383_v1  ;;  %v1531_v1 = vld [vmem:[#allocation2] sm:$0x6] }
  0xd9   : > { %v1410_v7 = vpop.f32.mrf.mxu1 }
  0xda   : > { %v1411_v10 = vadd.f32 %v1410_v7, %v1397_v6  ;;  %v3560_v6 = vld [vmem:[#allocation6 + $0xd0] sm:$0xff] }
  0xdb   : > { %v3572_v7 = vld [vmem:[#allocation6 + $0x130] sm:$0xff]  ;;  %2484 = vmatpush.bf16.msrb.mxu0 %v3560_v6  ;;  %v3589_v6 = vld [vmem:[#allocation6 + $0x1b8] sm:$0xff] }
  0xdc   : > { %2494 = vmatpush.bf16.msrb.mxu1 %v3572_v7 }
  0xde   : > { %v1424_v8 = vpop.f32.mrf.mxu2 }
  0xdf   : > { %v1398_v11 = vpop.f32.mrf.mxu0  ;;  %v1425_v16 = vadd.f32 %v1424_v8, %v1411_v10  ;;  %2485 = vmatpush.bf16.msrb.mxu0 %v3559_v20 }
  0xe0   : > { %v1438_v14 = vpop.f32.mrf.mxu3  ;;  %v1399_v21 = vadd.f32 %v1398_v11, %v1385_v15 }
  0xe1   : > { %v1412_v23 = vpop.f32.mrf.mxu1  ;;  %v1439_v24 = vadd.f32 %v1438_v14, %v1425_v16  ;;  %v1604_v14 = vunpack.c.l.b16 %v1531_v1 }
  0xe2   : > { %v1413_v32 = vadd.f32 %v1412_v23, %v1399_v21  ;;  %v3571_v21 = vld [vmem:[#allocation6 + $0x128] sm:$0xff] }
  0xe3   : > { %2495 = vmatpush.bf16.msrb.mxu1 %v3571_v21 }
  0xe6   : > { %v1426_v27 = vpop.f32.mrf.mxu2 }
  0xe7   : > { %v1427_v34 = vadd.f32 %v1426_v27, %v1413_v32  ;;  %v1679_v27 = vunpack.c.l.b16 %v1555_v17  ;;  %v1517_v32 = vld [vmem:[#allocation2 + $0xc] sm:$0x7]  ;;  %2496 = vmatpush.bf16.msrb.mxu1 %v3570_v36  ;;  %v3577_v17 = vld [vmem:[#allocation6 + $0x158] sm:$0xff] }
  0xe8   : > { %v1440_v38 = vpop.f32.mrf.mxu3  ;;  %2511 = vmatpush.bf16.msrb.mxu2 %v3577_v17  ;;  %v3566_v17 = vld [vmem:[#allocation6 + $0x100] sm:$0xff] }
  0xe9   : > { %v1441_v44 = vadd.f32 %v1440_v38, %v1427_v34  ;;  %v3550_v34 = vld [vmem:[#allocation6 + $0x80] sm:$0xff] }
  0xea   : > { %2472 = vmatpush.bf16.msra.mxu3 %v3550_v34 }
  0xeb   : > { %2497 = vmatpush.bf16.msrb.mxu1 %v3569_v12 }
  0xee   : > { %2521 = vmatpush.bf16.msrb.mxu3 %v3589_v6 }
  0xf7   : > { %v1452_v28 = vpop.f32.mrf.mxu0 }
  0xf8   : > { %v1453_v33 = vadd.f32 %v1452_v28, %v1439_v24  ;;  %v4091_v28 = vpack.c.b16 %v1604_v14, %v1604_v14 }
  0xfa   : > { %v1457_v35 = vmax.f32 %v1453_v33, 0.0  ;;  %v1736_v33 = vrot.slane %v1578_v18, 6  ;;  %v3129_v49 = vrot.slane %v4091_v28, 5  ;;  %v3588_v18 = vld [vmem:[#allocation6 + $0x1b0] sm:$0xff] }
  0xfb   : > { %2522 = vmatpush.bf16.msrb.mxu3 %v3588_v18 }
  0xfc   : > { %v1467_v42 = vrot.slane %v1457_v35, 4  ;;  %v1471_v43 = vpack.c.bf16 %v1457_v35, %v1457_v35  ;;  %v3558_v35 = vld [vmem:[#allocation6 + $0xc0] sm:$0xff] }
  0xfd   : > { %2486 = vmatpush.bf16.msrb.mxu0 %v3558_v35 }
  0xfe   : > { %v1472_v45 = vpack.c.bf16 %v1467_v42, %v1467_v42  ;;  %v1476_v46 = vshrl.u32 %v1471_v43, 16  ;;  %v1479_v55 = vshll.u32 %v1471_v43, 16 }
  0xff   : > { %v1454_v50 = vpop.f32.mrf.mxu0 }
 0x100   : > { %v1478_v54 = vrot.slane %v1476_v46, 7  ;;  %v1483_v56 = vshrl.u32 %v1472_v45, 16  ;;  %v1455_v57 = vadd.f32 %v1454_v50, %v1441_v44  ;;  %v1486_v0 = vshll.u32 %v1472_v45, 16 }
 0x101   : > { %v4093_v45 = vpack.c.b16 %v1679_v27, %v1679_v27 }
 0x102   : > { %v1481_v62 = vor.u32 %v1479_v55, %v1478_v54  ;;  %v1485_v63 = vrot.slane %v1483_v56, 7  ;;  %v1458_v2 = vmax.f32 %v1455_v57, 0.0  ;;  %v4099_v56 = vsel %vm651_vm0, %v1523_v37, %v1736_v33 }
 0x103   : > { %v1708_v7 = vshll.u32 %v4093_v45, 16 }
 0x104   : > { %v1488_v8 = vor.u32 %v1486_v0, %v1485_v63  ;;  %v1512_v9 = vsel %vm4083_vm5, %v1481_v62, %v1511_v60  ;;  %v1468_v10 = vrot.slane %v1458_v2, 4  ;;  %v1473_v11 = vpack.c.bf16 %v1458_v2, %v1458_v2 }
 0x105   : > { %1513 = vst [vmem:[#allocation2 + $0x4] sm:$0x7] %v1512_v9  ;;  %v4105_v0 = vpack.c.b16 %v1719_v39, %v1719_v39 }
 0x106   : > { %v1515_v13 = vsel %vm4083_vm5, %v1488_v8, %v1514_v61  ;;  %v1474_v15 = vpack.c.bf16 %v1468_v10, %v1468_v10  ;;  %v1490_v16 = vshrl.u32 %v1473_v11, 16  ;;  %v1493_v23 = vshll.u32 %v1473_v11, 16  ;;  %v3597_v11 = vld [vmem:[#allocation6 + $0x1f8] sm:$0xff] }
 0x107   : > { %1516 = vst [vmem:[#allocation2 + $0x8] sm:$0x7] %v1515_v13  ;;  %2535 = vmatpush.bf16.msra.mxu0 %v3597_v11 }
 0x108   : > { %v1492_v22 = vrot.slane %v1490_v16, 7  ;;  %v1497_v24 = vshrl.u32 %v1474_v15, 16  ;;  %v1500_v31 = vshll.u32 %v1474_v15, 16 }
 0x10a   : > { %v1495_v29 = vor.u32 %v1493_v23, %v1492_v22  ;;  %v1499_v30 = vrot.slane %v1497_v24, 7  ;;  %v3596_v23 = vld [vmem:[#allocation6 + $0x1f0] sm:$0xff] }
 0x10b   : > { %v3568_v24 = vld [vmem:[#allocation6 + $0x110] sm:$0xff]  ;;  %2536 = vmatpush.bf16.msra.mxu0 %v3596_v23 }
 0x10c   : > { %v1528_v38 = vld [vmem:[#allocation2 + $0x4] sm:$0x7]  ;;  %v1502_v40 = vor.u32 %v1500_v31, %v1499_v30  ;;  %v1518_v50 = vsel %vm4083_vm5, %v1495_v29, %v1517_v32  ;;  %2498 = vmatpush.bf16.msrb.mxu1 %v3568_v24 }
 0x10d   : > { %v1532_v42 = vld [vmem:[#allocation2 + $0x4] sm:$0x6]  ;;  %v1565_v44 = vunpack.c.l.b16 %v1528_v38  ;;  %1519 = vst [vmem:[#allocation2 + $0xc] sm:$0x7] %v1518_v50 }
 0x10e   : > { %v1539_v43 = vld [vmem:[#allocation2 + $0x4] sm:$0x7]  ;;  %v1529_v46 = vld [vmem:[#allocation2 + $0x8] sm:$0x7]  ;;  %v1521_v57 = vsel %vm4083_vm5, %v1502_v40, %v1520_v41  ;;  %v1605_v61 = vunpack.c.l.b16 %v1532_v42 }
 0x10f   : > { %v1543_v47 = vld [vmem:[#allocation2 + $0x4] sm:$0x6]  ;;  %v1620_v48 = vunpack.c.l.b16 %v1539_v43  ;;  %v1533_v51 = vld [vmem:[#allocation2 + $0x8] sm:$0x6]  ;;  %v1566_v54 = vunpack.c.l.b16 %v1529_v46  ;;  %v1569_v55 = vpack.c.b16 %v1565_v44, %v1565_v44  ;;  %1522 = vst [vmem:[#allocation2 + $0x10] sm:$0x7] %v1521_v57 }
 0x110   : > { %v1540_v52 = vld [vmem:[#allocation2 + $0x8] sm:$0x7]  ;;  %v4107_v1 = vld [vmem:[#allocation2 + $0x4] sm:$0x3]  ;;  %v1660_v4 = vunpack.c.l.b16 %v1543_v47  ;;  %v1606_v59 = vunpack.c.l.b16 %v1533_v51  ;;  %v1609_v20 = vpack.c.b16 %v1605_v61, %v1605_v61 }
 0x111   : > { %v1544_v53 = vld [vmem:[#allocation2 + $0x8] sm:$0x6]  ;;  %v1621_v62 = vunpack.c.l.b16 %v1540_v52  ;;  %v1624_v63 = vpack.c.b16 %v1620_v48, %v1620_v48  ;;  %v1570_v2 = vpack.c.b16 %v1566_v54, %v1566_v54  ;;  %v1582_v3 = vshll.u32 %v1569_v55, 16  ;;  %v1524_v35 = vld [vmem:[#allocation2 + $0x4] sm:$0x3] }
 0x112   : > { %v1552_v58 = vld [vmem:[#allocation2 + $0x8] sm:$0x7]  ;;  %v1661_v10 = vunpack.c.l.b16 %v1544_v53  ;;  %v1580_v13 = vshrl.u32 %v1569_v55, 16  ;;  %v4114_v31 = vpack.c.b16 %v1606_v59, %v1606_v59  ;;  %v4116_v33 = vpack.c.b16 %v1660_v4, %v1660_v4  ;;  %v3587_v47 = vld [vmem:[#allocation6 + $0x1a8] sm:$0xff] }
 0x113   : > { %v4103_v60 = vld [vmem:[#allocation2 + $0x8] sm:$0x6]  ;;  %v4110_v8 = vpack.c.b16 %v1621_v62, %v1621_v62  ;;  %v1631_v9 = vshll.u32 %v1624_v63, 16  ;;  %v1584_v14 = vrot.slane %v1582_v3, 1  ;;  %v1589_v15 = vshll.u32 %v1570_v2, 16  ;;  %v3595_v48 = vld [vmem:[#allocation6 + $0x1e8] sm:$0xff]  ;;  %2523 = vmatpush.bf16.msrb.mxu3 %v3587_v47 }
 0x114   : > { %v1676_v16 = vunpack.c.l.b16 %v1552_v58  ;;  %v1587_v19 = vshrl.u32 %v1570_v2, 16  ;;  %v1716_v29 = vunpack.c.l.b16 %v4103_v60  ;;  %v1536_v30 = vld [vmem:[#allocation2 + $0x8] sm:$0x3]  ;;  %v1629_v32 = vshrl.u32 %v1624_v63, 16  ;;  %v1530_v54 = vld [vmem:[#allocation2 + $0xc] sm:$0x7]  ;;  %2537 = vmatpush.bf16.msra.mxu0 %v3595_v48 }
 0x115   : > { %v1633_v21 = vrot.slane %v1631_v9, 1  ;;  %v1638_v22 = vshll.u32 %v4110_v8, 16  ;;  %v1585_v25 = vor.u32 %v1584_v14, %v1580_v13  ;;  %v1591_v26 = vrot.slane %v1589_v15, 1  ;;  %v3576_v40 = vld [vmem:[#allocation6 + $0x150] sm:$0xff]  ;;  %v3567_v55 = vld [vmem:[#allocation6 + $0x108] sm:$0xff] }
 0x116   : > { %v1680_v27 = vpack.c.b16 %v1676_v16, %v1676_v16  ;;  %v1738_v34 = vrot.slane %v4107_v1, 2  ;;  %v1636_v37 = vshrl.u32 %v4110_v8, 16  ;;  %v4120_v38 = vpack.c.b16 %v1661_v10, %v1661_v10  ;;  %v4122_v41 = vld [vmem:[#allocation2 + $0x8] sm:$0x3]  ;;  %v1534_v61 = vld [vmem:[#allocation2 + $0xc] sm:$0x6]  ;;  %2512 = vmatpush.bf16.msrb.mxu2 %v3576_v40  ;;  %2499 = vmatpush.bf16.msrb.mxu1 %v3567_v55 }
 0x117   : > { %v1592_v36 = vor.u32 %v1591_v26, %v1587_v19  ;;  %v4124_v42 = vor.u32 %v1633_v21, %v1629_v32  ;;  %v1640_v43 = vrot.slane %v1638_v22, 1  ;;  %v1742_v44 = vrot.slane %v1585_v25, 6  ;;  %v3575_v63 = vld [vmem:[#allocation6 + $0x148] sm:$0xff]  ;;  %v3586_v1 = vld [vmem:[#allocation6 + $0x1a0] sm:$0xff]  ;;  %v1525_v2 = vld [vmem:[#allocation2 + $0x8] sm:$0x3] }
 0x118   : > { %v1687_v39 = vshll.u32 %v1680_v27, 16  ;;  %v3131_v46 = vrot.slane %v1609_v20, 5  ;;  %v1685_v50 = vshrl.u32 %v1680_v27, 16  ;;  %v4126_v52 = vpack.c.b16 %v1716_v29, %v1716_v29  ;;  %v1541_v59 = vld [vmem:[#allocation2 + $0xc] sm:$0x7]  ;;  %v3574_v29 = vld [vmem:[#allocation6 + $0x140] sm:$0xff]  ;;  %2524 = vmatpush.bf16.msrb.mxu3 %v3586_v1 }
 0x119   : > { %v1744_v53 = vrot.slane %v1536_v30, 2  ;;  %v1748_v57 = vrot.slane %v1592_v36, 6  ;;  %v1765_v58 = vsel %vm655_vm1, %v3129_v49, %v1738_v34  ;;  %v1776_v60 = vsel %vm651_vm0, %v1524_v35, %v1742_v44  ;;  %v1542_v28 = vld [vmem:[#allocation2 + $0x10] sm:$0x7]  ;;  %v3594_v49 = vld [vmem:[#allocation6 + $0x1e0] sm:$0xff]  ;;  %v3592_v1 = vld [vmem:[#allocation6 + $0x1d0] sm:$0xff] }
 0x11a   : > { %v1689_v51 = vrot.slane %v1687_v39, 1  ;;  %v1567_v62 = vunpack.c.l.b16 %v1530_v54  ;;  %v3130_v4 = vrot.slane %v4116_v33, 7  ;;  %v1766_v5 = vsel %vm659_vm2, %v4099_v56, %v1765_v58  ;;  %v1545_v9 = vld [vmem:[#allocation2 + $0xc] sm:$0x6]  ;;  %v1546_v10 = vld [vmem:[#allocation2 + $0x10] sm:$0x6]  ;;  %2513 = vmatpush.bf16.msrb.mxu2 %v3575_v63  ;;  %2538 = vmatpush.bf16.msra.mxu0 %v3594_v49 }
 0x11b   : > { %v1779_v6 = vsel %vm655_vm1, %v3131_v46, %v1744_v53  ;;  %1964 = vst [vmem:[#allocation1] ss:$4 sm:$0xff] %v1766_v5  ;;  %v1607_v12 = vunpack.c.l.b16 %v1534_v61  ;;  %v1622_v13 = vunpack.c.l.b16 %v1541_v59  ;;  %v1641_v14 = vor.u32 %v1640_v43, %v1636_v37  ;;  %v1553_v20 = vld [vmem:[#allocation2 + $0xc] sm:$0x7]  ;;  %v1554_v21 = vld [vmem:[#allocation2 + $0x10] sm:$0x7]  ;;  %2500 = vmatpush.bf16.msrb.mxu1 %v3566_v17 }
 0x11c   : > { %v4132_v3 = vor.u32 %v1689_v51, %v1685_v50  ;;  %v1780_v8 = vsel %vm659_vm2, %v1776_v60, %v1779_v6  ;;  %v1571_v11 = vpack.c.b16 %v1567_v62, %v1567_v62  ;;  %v1740_v15 = vrot.slane %v4122_v41, 4  ;;  %v3585_v34 = vld [vmem:[#allocation6 + $0x198] sm:$0xff]  ;;  %v4152_v37 = vld [vmem:[#allocation2 + $0xc] sm:$0x6] }
 0x11d   : > { %v3132_v56 = vrot.slane %v4120_v38, 7  ;;  %1966 = vst [vmem:[#allocation1 + $0x1] ss:$4 sm:$0xff] %v1780_v8  ;;  %v1623_v16 = vunpack.c.l.b16 %v1542_v28  ;;  %v3133_v18 = vrot.slane %v4114_v31, 5  ;;  %v4143_v19 = vsel %vm651_vm0, %v1525_v2, %v1748_v57  ;;  %v3593_v35 = vld [vmem:[#allocation6 + $0x1d8] sm:$0xff]  ;;  %2525 = vmatpush.bf16.msrb.mxu3 %v3585_v34  ;;  %v3584_v63 = vld [vmem:[#allocation6 + $0x190] sm:$0xff] }
 0x11e   : > { %v1626_v22 = vpack.c.b16 %v1622_v13, %v1622_v13  ;;  %v1662_v23 = vunpack.c.l.b16 %v1545_v9  ;;  %v1741_v24 = vrot.slane %v4132_v3, 2  ;;  %v1596_v25 = vshll.u32 %v1571_v11, 16  ;;  %v4154_v44 = vld [vmem:[#allocation2 + $0xc] sm:$0x3]  ;;  %2514 = vmatpush.bf16.msrb.mxu2 %v3574_v29  ;;  %v1550_v57 = vld [vmem:[#allocation2 + $0x10] sm:$0x3]  ;;  %2539 = vmatpush.bf16.msra.mxu0 %v3593_v35 }
 0x11f   : > { %v1627_v26 = vpack.c.b16 %v1623_v16, %v1623_v16  ;;  %v1663_v27 = vunpack.c.l.b16 %v1546_v10  ;;  %v4146_v30 = vpack.c.b16 %v1607_v12, %v1607_v12  ;;  %v1677_v33 = vunpack.c.l.b16 %v1553_v20  ;;  %v1537_v51 = vld [vmem:[#allocation2 + $0xc] sm:$0x3]  ;;  %v1538_v2 = vld [vmem:[#allocation2 + $0x10] sm:$0x3]  ;;  %v1551_v10 = vld [vmem:[#allocation2 + $0x14] sm:$0x3] }
 0x120   : > { %v1645_v32 = vshll.u32 %v1626_v22, 16  ;;  %v4150_v36 = vsel %vm651_vm0, %v4124_v42, %v3130_v4  ;;  %v1594_v38 = vshrl.u32 %v1571_v11, 16  ;;  %v1598_v39 = vrot.slane %v1596_v25, 1  ;;  %v1526_v11 = vld [vmem:[#allocation2 + $0xc] sm:$0x3] }
 0x121   : > { %v1652_v40 = vshll.u32 %v1627_v26, 16  ;;  %v1678_v43 = vunpack.c.l.b16 %v1554_v21  ;;  %v4156_v47 = vpack.c.b16 %v1662_v23, %v1662_v23  ;;  %v1681_v48 = vpack.c.b16 %v1677_v33, %v1677_v33  ;;  %2526 = vmatpush.bf16.msrb.mxu3 %v3584_v63  ;;  %v3591_v23 = vld [vmem:[#allocation6 + $0x1c8] sm:$0xff] }
 0x122   : > { %v1647_v46 = vrot.slane %v1645_v32, 1  ;;  %v4159_v50 = vsel %vm651_vm0, %v1641_v14, %v3132_v56  ;;  %v1599_v53 = vor.u32 %v1598_v39, %v1594_v38  ;;  %v1643_v42 = vshrl.u32 %v1626_v22, 16  ;;  %2540 = vmatpush.bf16.msra.mxu0 %v3592_v1  ;;  %v3583_v22 = vld [vmem:[#allocation6 + $0x188] sm:$0xff]  ;;  %v1558_v32 = vld [vmem:[#allocation2 + $0x10] sm:$0x6]  ;;  %v3590_v39 = vld [vmem:[#allocation6 + $0x1c0] sm:$0xff] }
 0x123   : > { %v1654_v54 = vrot.slane %v1652_v40, 1  ;;  %v1682_v55 = vpack.c.b16 %v1678_v43, %v1678_v43  ;;  %v1650_v58 = vshrl.u32 %v1627_v26, 16  ;;  %v1667_v60 = vpack.c.b16 %v1663_v27, %v1663_v27  ;;  %v3603_v63 = vld [vmem:[#allocation6 + $0x228] sm:$0xff] }
 0x124   : > { %v1694_v61 = vshll.u32 %v1681_v48, 16  ;;  %v1717_v62 = vunpack.c.l.b16 %v4152_v37  ;;  %v1648_v4 = vor.u32 %v1647_v46, %v1643_v42  ;;  %v1692_v5 = vshrl.u32 %v1681_v48, 16  ;;  %v3611_v1 = vld [vmem:[%s4272_s8 + $0x28] sm:$0xff] }
 0x125   : > { %v1701_v6 = vshll.u32 %v1682_v55, 16  ;;  %v1746_v59 = vrot.slane %v4154_v44, 4  ;;  %v1655_v28 = vor.u32 %v1654_v54, %v1650_v58  ;;  %v1699_v8 = vshrl.u32 %v1682_v55, 16  ;;  %2527 = vmatpush.bf16.msrb.mxu3 %v3583_v22  ;;  %v3605_v54 = vld [vmem:[#allocation6 + $0x238] sm:$0xff] }
 0x126   : > { %v1696_v49 = vrot.slane %v1694_v61, 1  ;;  %v1750_v9 = vrot.slane %v1537_v51, 2  ;;  %v3134_v13 = vrot.slane %v4156_v47, 7  ;;  %v1752_v14 = vrot.slane %v1550_v57, 4  ;;  %2541 = vmatpush.bf16.msra.mxu0 %v3591_v23  ;;  %v3613_v55 = vld [vmem:[%s4272_s8 + $0x38] sm:$0xff] }
 0x127   : > { %v1703_v12 = vrot.slane %v1701_v6, 1  ;;  %v1754_v56 = vrot.slane %v1599_v53, 6  ;;  %v3135_v17 = vrot.slane %v4146_v30, 5  ;;  %v1756_v20 = vrot.slane %v1538_v2, 2  ;;  %v2563_v2 = vld [vmem:[%s4052_s27] sm:$0x3] }
 0x128   : > { %v1697_v16 = vor.u32 %v1696_v49, %v1692_v5  ;;  %v3136_v21 = vrot.slane %v1667_v60, 7  ;;  %v1793_v26 = vsel %vm655_vm1, %v3133_v18, %v1750_v9  ;;  %v1706_v29 = vshrl.u32 %v4093_v45, 16  ;;  %v3602_v5 = vld [vmem:[#allocation6 + $0x220] sm:$0xff]  ;;  %v2566_v49 = vld [vmem:[%s4052_s27 + $0xc] sm:$0x3] }
 0x129   : > { %v1704_v25 = vor.u32 %v1703_v12, %v1699_v8  ;;  %v1804_v27 = vsel %vm651_vm0, %v1526_v11, %v1754_v56  ;;  %v1794_v30 = vsel %vm659_vm2, %v4143_v19, %v1793_v26  ;;  %v1807_v34 = vsel %vm655_vm1, %v3135_v17, %v1756_v20  ;;  %v3582_v19 = vld [vmem:[#allocation6 + $0x180] sm:$0xff]  ;;  %v3601_v8 = vld [vmem:[#allocation6 + $0x218] sm:$0xff]  ;;  %v3608_v56 = vld [vmem:[%s4272_s8 + $0x10] sm:$0xff] }
 0x12a   : > { %v1747_v33 = vrot.slane %v1697_v16, 2  ;;  %v1710_v35 = vrot.slane %v1708_v7, 1  ;;  %v1808_v38 = vsel %vm659_vm2, %v1804_v27, %v1807_v34  ;;  %1968 = vst [vmem:[#allocation1 + $0x2] ss:$4 sm:$0xff] %v1794_v30  ;;  %v1758_v31 = vrot.slane %v1551_v10, 4  ;;  %2528 = vmatpush.bf16.msrb.mxu3 %v3582_v19  ;;  %2542 = vmatpush.bf16.msra.mxu0 %v3590_v39  ;;  %v3610_v6 = vld [vmem:[%s4272_s8 + $0x20] sm:$0xff] }
 0x12b   : > { %v1753_v37 = vrot.slane %v1704_v25, 2  ;;  %v1772_v18 = vsel %vm655_vm1, %v1740_v15, %v1741_v24  ;;  %1970 = vst [vmem:[#allocation1 + $0x3] ss:$4 sm:$0xff] %v1808_v38  ;;  %v1718_v43 = vunpack.c.l.b16 %v1558_v32  ;;  %v1797_v3 = vsel %vm651_vm0, %v1648_v4, %v3134_v13  ;;  %v2564_v4 = vld [vmem:[%s4052_s27 + $0x4] sm:$0x3]  ;;  %v3609_v10 = vld [vmem:[%s4272_s8 + $0x18] sm:$0xff] }
 0x12c   : > { %v1711_v40 = vor.u32 %v1710_v35, %v1706_v29  ;;  %v1773_v45 = vsel %vm659_vm2, %v4150_v36, %v1772_v18  ;;  %v1786_v7 = vsel %vm655_vm1, %v1746_v59, %v1747_v33  ;;  %v1721_v15 = vpack.c.b16 %v1717_v62, %v1717_v62  ;;  %v3612_v62 = vld [vmem:[%s4272_s8 + $0x30] sm:$0xff]  ;;  %v2565_v59 = vld [vmem:[%s4052_s27 + $0x8] sm:$0x3]  ;;  %v3598_v20 = vld [vmem:[#allocation6 + $0x200] sm:$0xff]  ;;  %s3614_s27 = sshll.u32 %s3899_s17, 3  ;;  %s2681_s17 = scalar_lea.sflag [#allocation5], %s429_s22 }
 0x12d   : > { %v1787_v44 = vsel %vm659_vm2, %v4159_v50, %v1786_v7  ;;  %v1800_v41 = vsel %vm655_vm1, %v1752_v14, %v1753_v37  ;;  %1972 = vst [vmem:[#allocation1 + $0x20] ss:$4 sm:$0xff] %v1773_v45  ;;  %v1811_v47 = vsel %vm651_vm0, %v1655_v28, %v3136_v21  ;;  %v1727_v48 = vrot.slane %v4105_v0, 1  ;;  %v3600_v14 = vld [vmem:[#allocation6 + $0x210] sm:$0xff]  ;;  %v3599_v16 = vld [vmem:[#allocation6 + $0x208] sm:$0xff]  ;;  %v3606_v21 = vld [vmem:[%s4272_s8] sm:$0xff]  ;;  %s2692_s11 = scalar_lea.hbm %s4274_s10, %s3614_s27 }
 0x12e   : > { %v1759_v24 = vrot.slane %v1711_v40, 2  ;;  %v1801_v46 = vsel %vm659_vm2, %v1797_v3, %v1800_v41  ;;  %1974 = vst [vmem:[#allocation1 + $0x21] ss:$4 sm:$0xff] %v1787_v44  ;;  %v1722_v50 = vpack.c.b16 %v1718_v43, %v1718_v43  ;;  %v1724_v53 = vrot.slane %v4126_v52, 1  ;;  %v3604_v52 = vld [vmem:[#allocation6 + $0x230] sm:$0xff]  ;;  %v3607_v17 = vld [vmem:[%s4272_s8 + $0x8] sm:$0xff] }
 0x12f   : > { %1976 = vst [vmem:[#allocation1 + $0x22] ss:$4 sm:$0xff] %v1801_v46  ;;  %v1725_v42 = vrot.slane %v1721_v15, 1  ;;  %v3682_v29 = vld [vmem:[%s4271_s7] ss:$0 sm:$0xff]  ;;  %s2695_s18 = sshll.u32 %s2692_s11, 4  ;;  %s2696_s18 = int_to_ptr.hbm [resolvable:$true] %s2695_s18 }
 0x130   : > { %v1814_v36 = vsel %vm655_vm1, %v1758_v31, %v1759_v24  ;;  %v1726_v0 = vrot.slane %v1722_v50, 1  ;;  %s3758_s20 = sshra.s32 %s2696_s18, 4  ;;  %s3764_s27 = scalar_lea.hbm %s4274_s10, 16  ;;  %s3759_s20 = int_to_ptr.hbm [resolvable:$true] %s3758_s20 }
 0x131   : > { %v1815_v51 = vsel %vm659_vm2, %v1811_v47, %v1814_v36  ;;  %s3760_s21 = scalar_lea.hbm %s3759_s20, 8  ;;  %p3765_p3 = scmp.lt.s32.totalorder %s3759_s20, %s4274_s10 }
 0x132   : > { %1978 = vst [vmem:[#allocation1 + $0x23] ss:$4 sm:$0xff] %v1815_v51  ;;  %v1979_v57 = vld.sshfl [vmem:[#allocation1] sm:$0xff pattern:$0x73625140]  ;;  %p3761_p0 = scmp.ne.s32.totalorder %s3759_s20, %s3760_s21  ;;  %p3766_p4 = scmp.lt.s32.totalorder %s3764_s27, %s3760_s21 }
 0x133   : > { %v1980_v58 = vld.sshfl [vmem:[#allocation1 + $0x8] sm:$0xff pattern:$0x73625140]  ;;  %2445 = vmatmul.bf16.vlgmr.msra.gmra.mxu1 %v1979_v57  ;;  %v1981_v60 = vld.sshfl [vmem:[#allocation1 + $0x10] sm:$0xff pattern:$0x73625140] }
 0x134   : > { %2459 = vmatmul.bf16.vlgmr.msra.gmra.mxu2 %v1980_v58  ;;  %v1982_v61 = vld.sshfl [vmem:[#allocation1 + $0x18] sm:$0xff pattern:$0x73625140]  ;;  %2473 = vmatmul.bf16.vlgmr.msra.gmra.mxu3 %v1981_v60  ;;  %p3762_p1 = pnand %p3761_p0, %p3916_p5  ;;  %p3767_p7 = por %p3766_p4, %p3765_p3 }
 0x135   : > { %2487 = vmatmul.bf16.vlgmr.msrb.gmra.mxu0 %v1982_v61  ;;  %1988 = vst [vmem:[#allocation1] ss:$4 sm:$0xff] %v1724_v53  ;;  %2549 = vmatpush.bf16.msra.mxu1 %v3605_v54 }
 0x136   : > { %1990 = vst [vmem:[#allocation1 + $0x1] ss:$4 sm:$0xff] %v1725_v42  ;;  %2648 = vmatpush.bf16.msra.mxu2 %v3613_v55  ;;  %p3763_p2 = pneg %p3762_p1 }
 0x137   : > { %1992 = vst [vmem:[#allocation1 + $0x2] ss:$4 sm:$0xff] %v1726_v0 }
 0x138   : > { %1994 = vst [vmem:[#allocation1 + $0x3] ss:$4 sm:$0xff] %v1727_v48  ;;  %v3683_v48 = vld [vmem:[%s4273_s9] ss:$0 sm:$0xff]  ;;  %p3768_p8 = pnand %p3767_p7, %p3763_p2 }
 0x139   : > { %2550 = vmatpush.bf16.msra.mxu1 %v3604_v52  ;;  %v1983_v9 = vld.sshfl [vmem:[#allocation1 + $0x20] sm:$0xff pattern:$0x73625140]  ;;  %v1984_v11 = vld.sshfl [vmem:[#allocation1 + $0x28] sm:$0xff pattern:$0x73625140] }
 0x13a   : > { %2649 = vmatpush.bf16.msra.mxu2 %v3612_v62  ;;  %v1985_v12 = vld.sshfl [vmem:[#allocation1 + $0x30] sm:$0xff pattern:$0x73625140]  ;;  %v1986_v13 = vld.sshfl [vmem:[#allocation1 + $0x38] sm:$0xff pattern:$0x73625140] }
 0x13d   : > { %2551 = vmatpush.bf16.msra.mxu1 %v3603_v63 }
 0x13e   : > { %2650 = vmatpush.bf16.msra.mxu2 %v3611_v1 }
 0x13f   : > { %v1995_v28 = vld.sshfl [vmem:[#allocation1] sm:$0xff pattern:$0x73625140] }
 0x140   : > { %2588 = vst [vmem:[#allocation1] ss:$4 sm:$0xff] %v2563_v2 }
 0x141   : > { %2591 = vst [vmem:[#allocation1 + $0x1] ss:$4 sm:$0xff] %v2564_v4  ;;  %2552 = vmatpush.bf16.msra.mxu1 %v3602_v5 }
 0x142   : > { %2651 = vmatpush.bf16.msra.mxu2 %v3610_v6  ;;  %2594 = vst [vmem:[#allocation1 + $0x2] ss:$4 sm:$0xff] %v2565_v59 }
 0x143   : > { %2597 = vst [vmem:[#allocation1 + $0x3] ss:$4 sm:$0xff] %v2566_v49  ;;  %2501 = vmatmul.bf16.vlgmr.msrb.gmra.mxu1 %v1983_v9 }
 0x144   : > { %2515 = vmatmul.bf16.vlgmr.msrb.gmra.mxu2 %v1984_v11  ;;  %2529 = vmatmul.bf16.vlgmr.msrb.gmra.mxu3 %v1985_v12 }
 0x145   : > { %2543 = vmatmul.bf16.vlgmr.msra.gmra.mxu0 %v1986_v13  ;;  %2553 = vmatpush.bf16.msra.mxu1 %v3601_v8 }
 0x146   : > { %2652 = vmatpush.bf16.msra.mxu2 %v3609_v10 }
 0x149   : > { %2554 = vmatpush.bf16.msra.mxu1 %v3600_v14 }
 0x14a   : > { %2653 = vmatpush.bf16.msra.mxu2 %v3608_v56  ;;  %v2598_v22 = vld.sshfl [vmem:[#allocation1] sm:$0xff pattern:$0x73625140] }
 0x14d   : > { %2555 = vmatpush.bf16.msra.mxu1 %v3599_v16 }
 0x14e   : > { %2654 = vmatpush.bf16.msra.mxu2 %v3607_v17 }
 0x151   : > { %2556 = vmatpush.bf16.msra.mxu1 %v3598_v20 }
 0x152   : > { %2655 = vmatpush.bf16.msra.mxu2 %v3606_v21 }
 0x154   : > { %2557 = vmatmul.bf16.vlgmr.msra.gmra.mxu1 %v1995_v28 }
 0x155   : > { %2656 = vmatmul.bf16.vlgmr.msra.gmra.mxu2 %v2598_v22 }
 0x1b0   : > { %v2446_v23 = vpop.f32.mrf.mxu1 }
 0x1b1   : > { %v2447_v30 = vadd.f32 %v3682_v29, %v2446_v23 }
 0x1b2   : > { %v2488_v33 = vpop.f32.mrf.mxu0 }
 0x1b7   : > { %v2460_v25 = vpop.f32.mrf.mxu2  ;;  %v2474_v27 = vpop.f32.mrf.mxu3 }
 0x1b8   : > { %v2448_v26 = vpop.f32.mrf.mxu1  ;;  %v2461_v35 = vadd.f32 %v2460_v25, %v2447_v30 }
 0x1b9   : > { %v2449_v18 = vadd.f32 %v3682_v29, %v2448_v26 }
 0x1ba   : > { %v2475_v38 = vadd.f32 %v2474_v27, %v2461_v35  ;;  %v2490_v19 = vpop.f32.mrf.mxu0 }
 0x1bc   : > { %v2489_v45 = vadd.f32 %v2488_v33, %v2475_v38 }
 0x1bf   : > { %v2462_v32 = vpop.f32.mrf.mxu2  ;;  %v2476_v37 = vpop.f32.mrf.mxu3 }
 0x1c0   : > { %v2502_v34 = vpop.f32.mrf.mxu1  ;;  %v2463_v40 = vadd.f32 %v2462_v32, %v2449_v18 }
 0x1c1   : > { %v2503_v7 = vadd.f32 %v2502_v34, %v2489_v45 }
 0x1c2   : > { %v2477_v43 = vadd.f32 %v2476_v37, %v2463_v40  ;;  %v2544_v46 = vpop.f32.mrf.mxu0 }
 0x1c4   : > { %v2491_v24 = vadd.f32 %v2490_v19, %v2477_v43 }
 0x1c7   : > { %v2516_v31 = vpop.f32.mrf.mxu2  ;;  %v2530_v41 = vpop.f32.mrf.mxu3 }
 0x1c8   : > { %v2504_v39 = vpop.f32.mrf.mxu1  ;;  %v2517_v44 = vadd.f32 %v2516_v31, %v2503_v7 }
 0x1c9   : > { %v2505_v36 = vadd.f32 %v2504_v39, %v2491_v24 }
 0x1ca   : > { %v2531_v15 = vadd.f32 %v2530_v41, %v2517_v44  ;;  %v2546_v61 = vpop.f32.mrf.mxu0 }
 0x1cc   : > { %v2545_v51 = vadd.f32 %v2544_v46, %v2531_v15 }
 0x1cf   : > { %v2518_v3 = vpop.f32.mrf.mxu2  ;;  %v2532_v55 = vpop.f32.mrf.mxu3 }
 0x1d0   : > { %v2519_v50 = vadd.f32 %v2518_v3, %v2505_v36 }
 0x1d1   : > { %v2558_v47 = vpop.f32.mrf.mxu1 }
 0x1d2   : > { %v2559_v42 = vadd.f32 %v2558_v47, %v2545_v51  ;;  %v2533_v57 = vadd.f32 %v2532_v55, %v2519_v50 }
 0x1d4   : > { %v2547_v63 = vadd.f32 %v2546_v61, %v2533_v57 }
 0x1d8   : > { %v2657_v53 = vpop.f32.mrf.mxu2 }
 0x1d9   : > { %v2658_v54 = vadd.f32 %v3683_v48, %v2657_v53  ;;  %v2560_v0 = vpop.f32.mrf.mxu1 }
 0x1da   : > { %v2561_v4 = vadd.f32 %v2560_v0, %v2547_v63 }
 0x1db   : > { %v2662_v58 = vadd.f32 %v2658_v54, %v2559_v42 }
 0x1dd   : > { %v2664_v60 = vmax.f32 %v2662_v58, 0.0 }
 0x1df   : > { %v2668_v52 = vrot.slane %v2664_v60, 4  ;;  %v2672_v62 = vpack.c.bf16 %v2664_v60, %v2664_v60 }
 0x1e0   : > { %v2659_v1 = vpop.f32.mrf.mxu2 }
 0x1e1   : > { %v2673_v2 = vpack.c.bf16 %v2668_v52, %v2668_v52  ;;  %2676 = vst [vmem:[%s431_s28] sm:$0x3] %v2672_v62  ;;  %v2660_v5 = vadd.f32 %v3683_v48, %v2659_v1 }
 0x1e3   : > { %2677 = vst [vmem:[%s431_s28 + $0x2] sm:$0x3] %v2673_v2  ;;  %v2663_v6 = vadd.f32 %v2660_v5, %v2561_v4 }
 0x1e5   : > { %v2665_v59 = vmax.f32 %v2663_v6, 0.0 }
 0x1e7   : > { %v2669_v28 = vrot.slane %v2665_v59, 4  ;;  %v2674_v49 = vpack.c.bf16 %v2665_v59, %v2665_v59 }
 0x1e9   : > { %v2675_v8 = vpack.c.bf16 %v2669_v28, %v2669_v28  ;;  %2678 = vst [vmem:[%s431_s28 + $0x4] sm:$0x3] %v2674_v49 }
 0x1eb   : > { %2679 = vst [vmem:[%s431_s28 + $0x6] sm:$0x3] %v2675_v8 }
 0x1ec   : > { %3771 = shalt.err (!%p3768_p8)
}
 0x1ed   : > { %s3821_s22 = smov 32   ;;  %s3822_s28 = smov 2  }
 0x1ee   : > { %3624 = dma.vmem_to_hbm [thread:$0]  (%p3916_p5), %s2694_s12, 128, %s2696_s18, %s2681_s17, %s3821_s22, %s3821_s22, %s3822_s28  }
 0x1ef PF: > { %p3641_p9 = scmp.ge.s32.totalorder %s3814_s16, 2  ;;  %s2710_s11 = sand.u32 1, %s3802_s13  }
 0x1f0   : > { %s2711_s26 = scalar_lea.sflag [#allocation5], %s2710_s11 }
 0x1f1   : > { %p3634_p10 = pnand %p3641_p9, %p3920_p6 }
 0x1f3   : > { %p3635_p11 = pneg %p3634_p10 }
 0x1f5   : > { %3797 = dma.done.wait (%p3635_p11), %s2711_s26, 128  }
 0x1f6   : > { %3799 = vsyncadd (%p3635_p11), %s2711_s26, 4294967168  ;;  %s4281_s20 = sld [smem:[#allocation12_spill]]  ;;  %p22_p12 = scmp.ge.s32.totalorder %s3903_s19, 4  }
 0x1f7   : > { %s4282_s13 = smov %s3806_s14  ;;  %s4283_s14 = smov %s3810_s15 }
 0x1f8   : > { %s4285_s16 = smov %s3903_s19  ;;  %24 = sbr.rel (!%p22_p12) target bundleno = 5 (0x5), region = 134 }
 0x1fc   : > { %s4284_s15 = smov %s4281_s20 }
 0x1fd   :  { %2717 = vsyncpa [#allocation4], 1 }
 0x1fe   :  { %2719 = vsyncpa [#allocation4 + $0x1], 1 }
 0x1ff   :  { %2720 = vsyncpa [#allocation7], 1 }
 0x200   :  { %2721 = vsyncpa [#allocation5], 1 }
 0x201   :  { %2723 = vsyncpa [#allocation5 + $0x1], 1 }

</bundles_post_ra>
